<compile_context>
chip_gen: v5e
topology: v5e:2x2
jax: 0.10.0
libtpu: 0.0.40
codegen_flags: <defaults>
</compile_context>

<pallas_src>
import functools

import jax
import jax.numpy as jnp
from jax.experimental import pallas as pl
from jax.experimental.pallas import tpu as pltpu

BN_EPS = 1e-3                     # nn.BatchNorm2d(C, 0.001)
LANE = 128
TILE_M_CAP = 2048                 # row-tile cap (per perf review; ~14 MiB/step at K=576)
VMEM_LIMIT = 48 * 1024 * 1024     # <= v7x 64 MiB physical, > 32 MiB scoped default
VMEM_SPEC = pl.BlockSpec(memory_space=pltpu.MemorySpace.VMEM)


def _round_up(n, m):
    return ((n + m - 1) // m) * m


def _tile_rows(M):
    """Row tile / grid extent / padded M."""
    if M <= TILE_M_CAP:
        return M, 1, M
    n = pl.cdiv(M, TILE_M_CAP)
    return TILE_M_CAP, n, n * TILE_M_CAP


# ----------------------------- Pallas kernels ------------------------------ #

def _linear_relu_kernel(x_ref, w_ref, b_ref, o_ref):
    # o = relu(x @ w + b)   (model[0] Linear + model[2] ReLU)
    y = jnp.dot(x_ref[...], w_ref[...], preferred_element_type=jnp.float32)
    o_ref[...] = jnp.maximum(y + b_ref[...], 0.0)


def _deconv_kernel(*refs, fuse_affine, relu_in, add_bias, want_stats):
    """One row-tile of a ConvTranspose2d(4, 2, 1) as a superset-patch matmul.

    Optional prologue: previous layer's folded BN affine (+ReLU) applied to the
    f32 patches (scale/shift are pre-tiled 9x along K in the wrapper); patches are
    then cast to bf16 for the MXU.  Optional epilogue: bias add and per-tile
    channel sum / sum-of-squares partials for this layer's training-mode BN.
    """
    it = iter(refs)
    p_ref = next(it)
    w_ref = next(it)
    sc_ref = next(it) if fuse_affine else None
    sh_ref = next(it) if fuse_affine else None
    b_ref = next(it) if add_bias else None
    y_ref = next(it)
    stat_ref = next(it) if want_stats else None

    p = p_ref[...]                                    # (tile_m, 9C) f32
    if fuse_affine:
        p = p * sc_ref[...] + sh_ref[...]             # exact f32 affine
    if relu_in:
        p = jnp.maximum(p, 0.0)
    y = jnp.dot(p.astype(jnp.bfloat16), w_ref[...],   # bf16 x bf16 -> f32 acc
                preferred_element_type=jnp.float32)
    if add_bias:
        y = y + b_ref[...]
    y_ref[...] = y                                    # lane-dense store
    if want_stats:
        n = y.shape[1]
        s = jnp.sum(y, axis=0, keepdims=True)         # (1, N) channel sums
        q = jnp.sum(y * y, axis=0, keepdims=True)     # (1, N) channel sum of squares
        rows = jax.lax.broadcasted_iota(jnp.int32, (2, n), 0)
        stat_ref[0] = jnp.where(rows == 0,
                                jnp.broadcast_to(s, (2, n)),
                                jnp.broadcast_to(q, (2, n)))


def _affine_kernel(y_ref, sc_ref, sh_ref, o_ref):
    # BN pass-2 (only for the materialized `feats`): y * scale + shift, no ReLU.
    o_ref[...] = y_ref[...] * sc_ref[...] + sh_ref[...]


# --------------------------- layout helpers (JAX) --------------------------- #

def _patches3x3(x_nhwc, fill=None):
    """3x3 superset patches for ConvTranspose2d(4, stride=2, padding=1).

    Row (b, m, n) holds the 3x3 input neighbourhood of (m, n) (tap-major,
    channel-minor, K = 9*C) which feeds all four output phases of that pixel.
    Border taps are filled with `fill` (per channel): zero for a plain conv input,
    -shift/scale when the previous layer's BN affine + ReLU is fused into the
    consumer kernel (so relu(scale*fill + shift) == 0 == the conv's zero pad).
    """
    B, H, W, C = x_nhwc.shape
    if fill is None:
        P = jnp.pad(x_nhwc, ((0, 0), (1, 1), (1, 1), (0, 0)))
    else:
        P = jnp.pad(x_nhwc - fill, ((0, 0), (1, 1), (1, 1), (0, 0))) + fill
    taps = [P[:, ty:ty + H, tx:tx + W, :] for ty in range(3) for tx in range(3)]
    p = jnp.stack(taps, axis=3)                       # [B, H, W, 9, C]
    return p.reshape(B * H * W, 9 * C)


def _super_weight(w_t, n_lanes):
    """PyTorch ConvTranspose2d weight (C_in, C_out, 4, 4) -> [9*C_in, n_lanes] bf16.

    Columns are phase-packed (py, px, c_out).  Phase (py, px) of output pixel
    (2m+py, 2n+px) uses input tap (ty, tx) of the 3x3 neighbourhood of (m, n) with
    kernel index ky = 3 + py - 2*ty (kx analogous); taps out of [0, 3] are zero.
    """
    c_in, c_out = w_t.shape[0], w_t.shape[1]
    rows = []
    for ty in range(3):
        for tx in range(3):
            cols = []
            for py in range(2):
                for px in range(2):
                    ky, kx = 3 + py - 2 * ty, 3 + px - 2 * tx
                    if 0 <= ky <= 3 and 0 <= kx <= 3:
                        cols.append(w_t[:, :, ky, kx])             # (C_in, C_out)
                    else:
                        cols.append(jnp.zeros((c_in, c_out), w_t.dtype))
            rows.append(jnp.concatenate(cols, axis=1))             # (C_in, 4*C_out)
    m = jnp.concatenate(rows, axis=0)                              # (9*C_in, 4*C_out)
    m = jnp.pad(m, ((0, 0), (0, n_lanes - 4 * c_out)))
    return m.astype(jnp.bfloat16)


def _interleave(y_flat, B, H, W, c_out):
    """Phase-packed [m_pad, n_lanes] -> NHWC [B, 2H, 2W, c_out]."""
    y = y_flat[:B * H * W, :4 * c_out].reshape(B, H, W, 2, 2, c_out)
    y = jnp.transpose(y, (0, 1, 3, 2, 4, 5))          # [B, H, py, W, px, C]
    return y.reshape(B, 2 * H, 2 * W, c_out)


# ------------------------------- wrappers ---------------------------------- #

def linear_relu(x, w, b):
    M, N = x.shape[0], w.shape[1]
    return pl.pallas_call(
        _linear_relu_kernel,
        out_shape=jax.ShapeDtypeStruct((M, N), jnp.float32),
        in_specs=[VMEM_SPEC, VMEM_SPEC, VMEM_SPEC],
        out_specs=VMEM_SPEC,
    )(x, w, b)


def _deconv_call(x_nhwc, w_super, *, scale_in=None, shift_in=None, relu_in=False,
                 bias=None, want_stats=True):
    """ConvTranspose2d(4,2,1) as a row-tiled [M, 9C] x [9C, n_lanes] matmul.

    Returns (y_flat [m_pad, n_lanes] raw / pre-BN, stats [n_tiles, 2, n_lanes] or None).
    """
    B, H, W, C = x_nhwc.shape
    K = 9 * C
    n_lanes = w_super.shape[1]
    M = B * H * W
    fuse_affine = scale_in is not None

    fill = None
    if fuse_affine:
        # Border fill so relu(scale*fill + shift) == 0 (exact zero padding of the
        # true, post-BN+ReLU conv input).  scale == 0 only if gamma == 0 (degenerate).
        safe = jnp.where(jnp.abs(scale_in) < 1e-12, 1.0, scale_in)
        fill = (-shift_in / safe).reshape(1, 1, 1, C).astype(jnp.float32)
    patches = _patches3x3(x_nhwc, fill)               # [M, 9C] f32

    tile_m, n_tiles, m_pad = _tile_rows(M)
    if m_pad != M:
        if fill is None:
            patches = jnp.pad(patches, ((0, m_pad - M), (0, 0)))
        else:                                         # pad rows must also map to 0
            fill_row = jnp.tile(fill.reshape(1, C), (1, 9))
            patches = jnp.concatenate(
                [patches, jnp.broadcast_to(fill_row, (m_pad - M, K))], axis=0)

    inputs = [patches, w_super]
    in_specs = [pl.BlockSpec((tile_m, K), lambda i: (i, 0)),
                pl.BlockSpec((K, n_lanes), lambda i: (0, 0))]   # weight stays resident
    if fuse_affine:
        sc_k = jnp.tile(scale_in.reshape(1, C), (1, 9)).astype(jnp.float32)
        sh_k = jnp.tile(shift_in.reshape(1, C), (1, 9)).astype(jnp.float32)
        inputs += [sc_k, sh_k]
        in_specs += [pl.BlockSpec((1, K), lambda i: (0, 0)),
                     pl.BlockSpec((1, K), lambda i: (0, 0))]
    if bias is not None:
        inputs.append(bias)
        in_specs.append(pl.BlockSpec((1, n_lanes), lambda i: (0, 0)))

    y_shape = jax.ShapeDtypeStruct((m_pad, n_lanes), jnp.float32)
    y_spec = pl.BlockSpec((tile_m, n_lanes), lambda i: (i, 0))
    if want_stats:
        out_shape = (y_shape,
                     jax.ShapeDtypeStruct((n_tiles, 2, n_lanes), jnp.float32))
        out_specs = [y_spec, pl.BlockSpec((1, 2, n_lanes), lambda i: (i, 0, 0))]
    else:
        out_shape = y_shape
        out_specs = y_spec

    kern = functools.partial(_deconv_kernel, fuse_affine=fuse_affine,
                             relu_in=relu_in, add_bias=bias is not None,
                             want_stats=want_stats)
    res = pl.pallas_call(
        kern,
        out_shape=out_shape,
        grid_spec=pltpu.PrefetchScalarGridSpec(
            num_scalar_prefetch=0, grid=(n_tiles,),
            in_specs=in_specs, out_specs=out_specs),
        compiler_params=pltpu.CompilerParams(
            dimension_semantics=("parallel",),          # row tiles shard across TCs
            vmem_limit_bytes=VMEM_LIMIT),
    )(*inputs)
    if want_stats:
        return res[0], res[1]
    return res, None


def _bn_fold(stats, gamma, beta, c_out, M):
    """Exact training-mode BN statistics from per-tile partials -> folded scale/shift."""
    count = 4.0 * M                                   # = B * (2H) * (2W) output pixels
    s = stats[:, 0, :4 * c_out].reshape(-1, 4, c_out).sum(axis=(0, 1))
    q = stats[:, 1, :4 * c_out].reshape(-1, 4, c_out).sum(axis=(0, 1))
    mean = s / count
    # NOTE: E[y^2] - mean^2 in f32 is fine while |mean| is not >> std (random-init
    # decoder activations); switch to a shifted / Welford accumulation otherwise.
    var = jnp.maximum(q / count - mean * mean, 0.0)
    scale = gamma * jax.lax.rsqrt(var + BN_EPS)
    shift = beta - mean * scale
    return scale, shift


def _affine_flat(y_flat, scale, shift, c_out, n_lanes):
    """BN pass-2 on the lane-dense phase-packed layout (only used for `feats`)."""
    m_pad = y_flat.shape[0]
    tile_m, n_tiles, _ = _tile_rows(m_pad)
    sc = jnp.pad(jnp.tile(scale, 4), (0, n_lanes - 4 * c_out)).reshape(1, n_lanes)
    sh = jnp.pad(jnp.tile(shift, 4), (0, n_lanes - 4 * c_out)).reshape(1, n_lanes)
    return pl.pallas_call(
        _affine_kernel,
        out_shape=jax.ShapeDtypeStruct((m_pad, n_lanes), jnp.float32),
        grid_spec=pltpu.PrefetchScalarGridSpec(
            num_scalar_prefetch=0, grid=(n_tiles,),
            in_specs=[pl.BlockSpec((tile_m, n_lanes), lambda i: (i, 0)),
                      pl.BlockSpec((1, n_lanes), lambda i: (0, 0)),
                      pl.BlockSpec((1, n_lanes), lambda i: (0, 0))],
            out_specs=pl.BlockSpec((tile_m, n_lanes), lambda i: (i, 0))),
        compiler_params=pltpu.CompilerParams(
            dimension_semantics=("parallel",), vmem_limit_bytes=VMEM_LIMIT),
    )(y_flat, sc, sh)


# ------------------------- params & full forward ---------------------------- #

def init_params(key, image_size, num_classes, num_channels, z_dim):
    s = image_size // 16
    ks = jax.random.split(key, 16)

    def rnd(k, shape, scale):
        return (scale * jax.random.normal(k, shape)).astype(jnp.float32)

    # PyTorch parameter layout.  ct{1,2,3}_b exist in the nn.Module but are
    # mathematically cancelled by the train-mode BatchNorm that follows each conv,
    # so the Pallas path never uses them (the pure-JAX reference does, proving the
    # cancellation numerically).
    return dict(
        lin_w=rnd(ks[0], (z_dim + num_classes, 64 * s * s), 0.10),
        lin_b=rnd(ks[1], (64 * s * s,), 0.05),
        ct1_w=rnd(ks[2], (64, 64, 4, 4), 0.05),   # ConvT layout (C_in, C_out, kH, kW)
        ct1_b=rnd(ks[3], (64,), 0.02),
        bn1_g=1.0 + rnd(ks[4], (64,), 0.05),
        bn1_b=rnd(ks[5], (64,), 0.05),
        ct2_w=rnd(ks[6], (64, 32, 4, 4), 0.05),
        ct2_b=rnd(ks[7], (32,), 0.02),
        bn2_g=1.0 + rnd(ks[8], (32,), 0.05),
        bn2_b=rnd(ks[9], (32,), 0.05),
        ct3_w=rnd(ks[10], (32, 32, 4, 4), 0.05),
        ct3_b=rnd(ks[11], (32,), 0.02),
        bn3_g=1.0 + rnd(ks[12], (32,), 0.05),
        bn3_b=rnd(ks[13], (32,), 0.05),
        ct4_w=rnd(ks[14], (32, num_channels, 4, 4), 0.05),
        ct4_b=rnd(ks[15], (num_channels,), 0.02),
    )


def prepare_params(params, image_size, num_channels):
    """One-time weight layout prep (hoisted out of the per-forward hot path)."""
    s = image_size // 16
    lin_n = 64 * s * s
    lin_pad = _round_up(lin_n, LANE)
    nc_pad = _round_up(4 * num_channels, LANE)
    return dict(
        lin_w=jnp.pad(params["lin_w"], ((0, 0), (0, lin_pad - lin_n))),
        lin_b=jnp.pad(params["lin_b"], (0, lin_pad - lin_n)).reshape(1, lin_pad),
        ct1=_super_weight(params["ct1_w"], _round_up(4 * 64, LANE)),    # (576, 256) bf16
        bn1_g=params["bn1_g"], bn1_b=params["bn1_b"],
        ct2=_super_weight(params["ct2_w"], _round_up(4 * 32, LANE)),    # (576, 128) bf16
        bn2_g=params["bn2_g"], bn2_b=params["bn2_b"],
        ct3=_super_weight(params["ct3_w"], _round_up(4 * 32, LANE)),    # (288, 128) bf16
        bn3_g=params["bn3_g"], bn3_b=params["bn3_b"],
        ct4=_super_weight(params["ct4_w"], nc_pad),                     # (288, 128) bf16
        ct4_b=jnp.pad(jnp.tile(params["ct4_b"], 4),
                      (0, nc_pad - 4 * num_channels)).reshape(1, nc_pad),
    )


def conditional_decoder_forward(prep, z, y_hot, image_size, num_channels):
    s = image_size // 16
    B = z.shape[0]
    # torch.cat((z, y_hot.float()), 1)
    x = jnp.concatenate([z, y_hot.astype(jnp.float32)], axis=1)

    # model[0:3]: Linear -> View((-1, 64, s, s)) -> ReLU  (ReLU fused in kernel)
    h = linear_relu(x, prep["lin_w"], prep["lin_b"])[:, :64 * s * s]
    h = h.reshape(B, 64, s, s).transpose(0, 2, 3, 1)              # NCHW view -> NHWC

    # model[3:5]: ConvT(64->64) + BN(64).  BN1 affine + ReLU (model[5]) are fused
    # into the next layer's prologue; y1 stays raw (pre-BN).
    y1, st1 = _deconv_call(h, prep["ct1"])
    sc1, sh1 = _bn_fold(st1, prep["bn1_g"], prep["bn1_b"], 64, B * s * s)
    y1_img = _interleave(y1, B, s, s, 64)

    # model[6:8]: ConvT(64->32) + BN(32)   (prologue = BN1 affine + ReLU)
    y2, st2 = _deconv_call(y1_img, prep["ct2"], scale_in=sc1, shift_in=sh1,
                           relu_in=True)
    sc2, sh2 = _bn_fold(st2, prep["bn2_g"], prep["bn2_b"], 32, B * 4 * s * s)
    y2_img = _interleave(y2, B, 2 * s, 2 * s, 32)

    # model[9:11]: ConvT(32->32) + BN(32)  (prologue = BN2 affine + ReLU)
    y3, st3 = _deconv_call(y2_img, prep["ct3"], scale_in=sc2, shift_in=sh2,
                           relu_in=True)
    sc3, sh3 = _bn_fold(st3, prep["bn3_g"], prep["bn3_b"], 32, B * 16 * s * s)

    # features_before_last_conv must be materialized -> lane-dense affine pass.
    feats_flat = _affine_flat(y3, sc3, sh3, 32, y3.shape[1])
    feats = _interleave(feats_flat, B, 4 * s, 4 * s, 32)          # NHWC [B, 8s, 8s, 32]

    # model[11:]: ReLU + ConvT(32->num_channels) + bias (ReLU folded on the patches;
    # zero border padding is consistent since relu(0) == 0).
    img_flat, _ = _deconv_call(feats, prep["ct4"], relu_in=True,
                               bias=prep["ct4_b"], want_stats=False)
    img = _interleave(img_flat, B, 8 * s, 8 * s, num_channels)

    # Back to PyTorch NCHW for both returned tensors.
    return feats.transpose(0, 3, 1, 2), img.transpose(0, 3, 1, 2)


# -------------------------- pure-JAX reference ------------------------------ #

def _ref_deconv(x_nhwc, w_t, b):
    # ConvTranspose2d(4, 2, 1) == conv over the 2x zero-dilated, 2-padded input
    # with the spatially flipped kernel.
    k = jnp.transpose(w_t[:, :, ::-1, ::-1], (2, 3, 0, 1))        # HWIO
    y = jax.lax.conv_general_dilated(
        x_nhwc, k, window_strides=(1, 1), padding=((2, 2), (2, 2)),
        lhs_dilation=(2, 2), dimension_numbers=("NHWC", "HWIO", "NHWC"),
        precision=jax.lax.Precision.HIGHEST)
    return y + b.reshape(1, 1, 1, -1)


def _ref_bn(y, gamma, beta):
    mean = jnp.mean(y, axis=(0, 1, 2))
    var = jnp.mean(jnp.square(y - mean), axis=(0, 1, 2))
    return (y - mean) * jax.lax.rsqrt(var + BN_EPS) * gamma + beta


def _ref_forward(params, z, y_hot, image_size):
    s = image_size // 16
    B = z.shape[0]
    x = jnp.concatenate([z, y_hot.astype(jnp.float32)], axis=1)
    h = jnp.maximum(jnp.dot(x, params["lin_w"],
                            precision=jax.lax.Precision.HIGHEST) + params["lin_b"], 0.0)
    h = h.reshape(B, 64, s, s).transpose(0, 2, 3, 1)
    h = jnp.maximum(_ref_bn(_ref_deconv(h, params["ct1_w"], params["ct1_b"]),
                            params["bn1_g"], params["bn1_b"]), 0.0)
    h = jnp.maximum(_ref_bn(_ref_deconv(h, params["ct2_w"], params["ct2_b"]),
                            params["bn2_g"], params["bn2_b"]), 0.0)
    feats = _ref_bn(_ref_deconv(h, params["ct3_w"], params["ct3_b"]),
                    params["bn3_g"], params["bn3_b"])
    img = _ref_deconv(jnp.maximum(feats, 0.0), params["ct4_w"], params["ct4_b"])
    return feats.transpose(0, 3, 1, 2), img.transpose(0, 3, 1, 2)


if __name__ == "__main__":
    image_size, num_classes, num_channels, z_dim = 16, 4, 3, 8
    B = 2

    key = jax.random.PRNGKey(0)
    kp, kz, kl = jax.random.split(key, 3)
    params = init_params(kp, image_size, num_classes, num_channels, z_dim)
    prep = prepare_params(params, image_size, num_channels)   # weight layout prep, once

    z = jax.random.normal(kz, (B, z_dim), dtype=jnp.float32)
    labels = jax.random.randint(kl, (B,), 0, num_classes)
    y_hot = jax.nn.one_hot(labels, num_classes, dtype=jnp.float32)

    fwd = jax.jit(conditional_decoder_forward, static_argnums=(3, 4))
    feats, img = fwd(prep, z, y_hot, image_size, num_channels)
    jax.block_until_ready((feats, img))

    assert feats.shape == (B, 32, image_size // 2, image_size // 2), feats.shape
    assert img.shape == (B, num_channels, image_size, image_size), img.shape
    assert bool(jnp.all(jnp.isfinite(feats))) and bool(jnp.all(jnp.isfinite(img)))

    # Cross-check the Pallas path against a pure-JAX/XLA reference of the module.
    feats_ref, img_ref = jax.jit(_ref_forward, static_argnums=3)(params, z, y_hot, image_size)
    assert bool(jnp.allclose(feats, feats_ref, rtol=2e-2, atol=2e-2)), "feats mismatch"
    assert bool(jnp.allclose(img, img_ref, rtol=2e-2, atol=2e-2)), "img mismatch"

    print("KERNEL_OK")
</pallas_src>

<mosaic_0001>
module attributes {stable_mosaic.version = 11 : i64} {
  func.func @_linear_relu_kernel(%arg0: memref<2x12xf32, #tpu.memory_space<vmem>>, %arg1: memref<12x128xf32, #tpu.memory_space<vmem>>, %arg2: memref<1x128xf32, #tpu.memory_space<vmem>>, %arg3: memref<2x128xf32, #tpu.memory_space<vmem>>) attributes {dimension_semantics = [], scalar_prefetch = 0 : i64, scratch_operands = 0 : i64, tpu.core_type = #tpu.core_type<tc>} {
    %c0 = arith.constant 0 : index
    %c0_0 = arith.constant 0 : index
    %0 = vector.load %arg0[%c0, %c0_0] : memref<2x12xf32, #tpu.memory_space<vmem>>, vector<2x12xf32>
    %c0_1 = arith.constant 0 : index
    %c0_2 = arith.constant 0 : index
    %1 = vector.load %arg1[%c0_1, %c0_2] : memref<12x128xf32, #tpu.memory_space<vmem>>, vector<12x128xf32>
    %cst = arith.constant dense<0.000000e+00> : vector<2x128xf32>
    %2 = tpu.matmul %0, %1, %cst {dimension_numbers = #tpu.dot_dimension_numbers<[1], [0], [0], [1], [0, 0, 1, 1], [], []>} : vector<2x12xf32>, vector<12x128xf32>, vector<2x128xf32> -> vector<2x128xf32>
    %c0_3 = arith.constant 0 : index
    %c0_4 = arith.constant 0 : index
    %3 = vector.load %arg2[%c0_3, %c0_4] : memref<1x128xf32, #tpu.memory_space<vmem>>, vector<1x128xf32>
    %4 = vector.broadcast %3 : vector<1x128xf32> to vector<2x128xf32>
    %5 = arith.addf %2, %4 : vector<2x128xf32>
    %cst_5 = arith.constant 0.000000e+00 : f32
    %6 = vector.broadcast %cst_5 : f32 to vector<2x128xf32>
    %7 = arith.maximumf %5, %6 : vector<2x128xf32>
    %c0_6 = arith.constant 0 : index
    %c0_7 = arith.constant 0 : index
    %8 = vector.load %arg3[%c0_6, %c0_7] : memref<2x128xf32, #tpu.memory_space<vmem>>, vector<2x128xf32>
    tpu.vector_store %arg3[%c0_6, %c0_7], %7 {strides = array<i32>} : memref<2x128xf32, #tpu.memory_space<vmem>>, vector<2x128xf32>,
    return
  }
}

module attributes {stable_mosaic.version = 11 : i64} {
  func.func @_deconv_kernel(%arg0: i32, %arg1: memref<2x576xf32, #tpu.memory_space<vmem>>, %arg2: memref<576x256xbf16, #tpu.memory_space<vmem>>, %arg3: memref<2x256xf32, #tpu.memory_space<vmem>>, %arg4: memref<1x2x256xf32, #tpu.memory_space<vmem>>) attributes {dimension_semantics = [#tpu.dimension_semantics<parallel>], iteration_bounds = array<i64: 1>, scalar_prefetch = 0 : i64, scratch_operands = 0 : i64, tpu.core_type = #tpu.core_type<tc>, window_params = [{transform_indices = @transform_0, window_bounds = array<i64: 2, 576>}, {pipeline_mode = #tpu.pipeline_mode<synchronous>, transform_indices = @transform_1, window_bounds = array<i64: 576, 256>}, {transform_indices = @transform_2, window_bounds = array<i64: 2, 256>}, {transform_indices = @transform_3, window_bounds = array<i64: 1, 2, 256>}]} {
    %c0 = arith.constant 0 : index
    %c0_0 = arith.constant 0 : index
    %0 = vector.load %arg1[%c0, %c0_0] : memref<2x576xf32, #tpu.memory_space<vmem>>, vector<2x576xf32>
    %1 = arith.truncf %0 : vector<2x576xf32> to vector<2x576xbf16>
    %c0_1 = arith.constant 0 : index
    %c0_2 = arith.constant 0 : index
    %2 = vector.load %arg2[%c0_1, %c0_2] : memref<576x256xbf16, #tpu.memory_space<vmem>>, vector<576x256xbf16>
    %cst = arith.constant dense<0.000000e+00> : vector<2x256xf32>
    %3 = tpu.matmul %1, %2, %cst {dimension_numbers = #tpu.dot_dimension_numbers<[1], [0], [0], [1], [0, 0, 1, 1], [], []>} : vector<2x576xbf16>, vector<576x256xbf16>, vector<2x256xf32> -> vector<2x256xf32>
    %c0_3 = arith.constant 0 : index
    %c0_4 = arith.constant 0 : index
    %4 = vector.load %arg3[%c0_3, %c0_4] : memref<2x256xf32, #tpu.memory_space<vmem>>, vector<2x256xf32>
    tpu.vector_store %arg3[%c0_3, %c0_4], %3 {strides = array<i32>} : memref<2x256xf32, #tpu.memory_space<vmem>>, vector<2x256xf32>,
    %cst_5 = arith.constant dense<0.000000e+00> : vector<256xf32>
    %5 = vector.multi_reduction <add>, %3, %cst_5 [0] : vector<2x256xf32> to vector<256xf32>
    %6 = vector.shape_cast %5 : vector<256xf32> to vector<1x256xf32>
    %7 = arith.mulf %3, %3 : vector<2x256xf32>
    %cst_6 = arith.constant dense<0.000000e+00> : vector<256xf32>
    %8 = vector.multi_reduction <add>, %7, %cst_6 [0] : vector<2x256xf32> to vector<256xf32>
    %9 = vector.shape_cast %8 : vector<256xf32> to vector<1x256xf32>
    %10 = tpu.iota {dimensions = array<i32: 0>} : vector<2x256xi32>
    %c0_i32 = arith.constant 0 : i32
    %11 = vector.broadcast %c0_i32 : i32 to vector<2x256xi32>
    %12 = arith.cmpi eq, %10, %11 : vector<2x256xi32>
    %13 = vector.shape_cast %6 : vector<1x256xf32> to vector<1x256xf32>
    %14 = vector.broadcast %13 : vector<1x256xf32> to vector<2x256xf32>
    %15 = vector.shape_cast %9 : vector<1x256xf32> to vector<1x256xf32>
    %16 = vector.broadcast %15 : vector<1x256xf32> to vector<2x256xf32>
    %17 = arith.select %12, %14, %16 : vector<2x256xi1>, vector<2x256xf32>
    %c0_7 = arith.constant 0 : index
    %c0_8 = arith.constant 0 : index
    %c0_9 = arith.constant 0 : index
    %18 = vector.load %arg4[%c0_7, %c0_8, %c0_9] : memref<1x2x256xf32, #tpu.memory_space<vmem>>, vector<1x2x256xf32>
    %19 = vector.shape_cast %18 : vector<1x2x256xf32> to vector<2x256xf32>
    %20 = vector.shape_cast %17 : vector<2x256xf32> to vector<1x2x256xf32>
    tpu.vector_store %arg4[%c0_7, %c0_8, %c0_9], %20 {strides = array<i32>} : memref<1x2x256xf32, #tpu.memory_space<vmem>>, vector<1x2x256xf32>,
    return
  }
  func.func @transform_0(%arg0: i32) -> (i32, i32) {
    %c0_i32 = arith.constant 0 : i32
    %c0_i32_0 = arith.constant 0 : i32
    return %arg0, %c0_i32 : i32, i32
  }
  func.func @transform_1(%arg0: i32) -> (i32, i32) {
    %c0_i32 = arith.constant 0 : i32
    %c0_i32_0 = arith.constant 0 : i32
    %c0_i32_1 = arith.constant 0 : i32
    return %c0_i32, %c0_i32_0 : i32, i32
  }
  func.func @transform_2(%arg0: i32) -> (i32, i32) {
    %c0_i32 = arith.constant 0 : i32
    %c0_i32_0 = arith.constant 0 : i32
    return %arg0, %c0_i32 : i32, i32
  }
  func.func @transform_3(%arg0: i32) -> (i32, i32, i32) {
    %c0_i32 = arith.constant 0 : i32
    %c0_i32_0 = arith.constant 0 : i32
    %c0_i32_1 = arith.constant 0 : i32
    return %arg0, %c0_i32, %c0_i32_0 : i32, i32, i32
  }
}

module attributes {stable_mosaic.version = 11 : i64} {
  func.func @_deconv_kernel(%arg0: i32, %arg1: memref<8x576xf32, #tpu.memory_space<vmem>>, %arg2: memref<576x128xbf16, #tpu.memory_space<vmem>>, %arg3: memref<1x576xf32, #tpu.memory_space<vmem>>, %arg4: memref<1x576xf32, #tpu.memory_space<vmem>>, %arg5: memref<8x128xf32, #tpu.memory_space<vmem>>, %arg6: memref<1x2x128xf32, #tpu.memory_space<vmem>>) attributes {dimension_semantics = [#tpu.dimension_semantics<parallel>], iteration_bounds = array<i64: 1>, scalar_prefetch = 0 : i64, scratch_operands = 0 : i64, tpu.core_type = #tpu.core_type<tc>, window_params = [{transform_indices = @transform_0, window_bounds = array<i64: 8, 576>}, {pipeline_mode = #tpu.pipeline_mode<synchronous>, transform_indices = @transform_1, window_bounds = array<i64: 576, 128>}, {pipeline_mode = #tpu.pipeline_mode<synchronous>, transform_indices = @transform_2, window_bounds = array<i64: 1, 576>}, {pipeline_mode = #tpu.pipeline_mode<synchronous>, transform_indices = @transform_3, window_bounds = array<i64: 1, 576>}, {transform_indices = @transform_4, window_bounds = array<i64: 8, 128>}, {transform_indices = @transform_5, window_bounds = array<i64: 1, 2, 128>}]} {
    %c0 = arith.constant 0 : index
    %c0_0 = arith.constant 0 : index
    %0 = vector.load %arg1[%c0, %c0_0] : memref<8x576xf32, #tpu.memory_space<vmem>>, vector<8x576xf32>
    %c0_1 = arith.constant 0 : index
    %c0_2 = arith.constant 0 : index
    %1 = vector.load %arg3[%c0_1, %c0_2] : memref<1x576xf32, #tpu.memory_space<vmem>>, vector<1x576xf32>
    %2 = vector.broadcast %1 : vector<1x576xf32> to vector<8x576xf32>
    %3 = arith.mulf %0, %2 : vector<8x576xf32>
    %c0_3 = arith.constant 0 : index
    %c0_4 = arith.constant 0 : index
    %4 = vector.load %arg4[%c0_3, %c0_4] : memref<1x576xf32, #tpu.memory_space<vmem>>, vector<1x576xf32>
    %5 = vector.broadcast %4 : vector<1x576xf32> to vector<8x576xf32>
    %6 = arith.addf %3, %5 : vector<8x576xf32>
    %cst = arith.constant 0.000000e+00 : f32
    %7 = vector.broadcast %cst : f32 to vector<8x576xf32>
    %8 = arith.maximumf %6, %7 : vector<8x576xf32>
    %9 = arith.truncf %8 : vector<8x576xf32> to vector<8x576xbf16>
    %c0_5 = arith.constant 0 : index
    %c0_6 = arith.constant 0 : index
    %10 = vector.load %arg2[%c0_5, %c0_6] : memref<576x128xbf16, #tpu.memory_space<vmem>>, vector<576x128xbf16>
    %cst_7 = arith.constant dense<0.000000e+00> : vector<8x128xf32>
    %11 = tpu.matmul %9, %10, %cst_7 {dimension_numbers = #tpu.dot_dimension_numbers<[1], [0], [0], [1], [0, 0, 1, 1], [], []>} : vector<8x576xbf16>, vector<576x128xbf16>, vector<8x128xf32> -> vector<8x128xf32>
    %c0_8 = arith.constant 0 : index
    %c0_9 = arith.constant 0 : index
    %12 = vector.load %arg5[%c0_8, %c0_9] : memref<8x128xf32, #tpu.memory_space<vmem>>, vector<8x128xf32>
    tpu.vector_store %arg5[%c0_8, %c0_9], %11 {strides = array<i32>} : memref<8x128xf32, #tpu.memory_space<vmem>>, vector<8x128xf32>,
    %cst_10 = arith.constant dense<0.000000e+00> : vector<128xf32>
    %13 = vector.multi_reduction <add>, %11, %cst_10 [0] : vector<8x128xf32> to vector<128xf32>
    %14 = vector.shape_cast %13 : vector<128xf32> to vector<1x128xf32>
    %15 = arith.mulf %11, %11 : vector<8x128xf32>
    %cst_11 = arith.constant dense<0.000000e+00> : vector<128xf32>
    %16 = vector.multi_reduction <add>, %15, %cst_11 [0] : vector<8x128xf32> to vector<128xf32>
    %17 = vector.shape_cast %16 : vector<128xf32> to vector<1x128xf32>
    %18 = tpu.iota {dimensions = array<i32: 0>} : vector<2x128xi32>
    %c0_i32 = arith.constant 0 : i32
    %19 = vector.broadcast %c0_i32 : i32 to vector<2x128xi32>
    %20 = arith.cmpi eq, %18, %19 : vector<2x128xi32>
    %21 = vector.shape_cast %14 : vector<1x128xf32> to vector<1x128xf32>
    %22 = vector.broadcast %21 : vector<1x128xf32> to vector<2x128xf32>
    %23 = vector.shape_cast %17 : vector<1x128xf32> to vector<1x128xf32>
    %24 = vector.broadcast %23 : vector<1x128xf32> to vector<2x128xf32>
    %25 = arith.select %20, %22, %24 : vector<2x128xi1>, vector<2x128xf32>
    %c0_12 = arith.constant 0 : index
    %c0_13 = arith.constant 0 : index
    %c0_14 = arith.constant 0 : index
    %26 = vector.load %arg6[%c0_12, %c0_13, %c0_14] : memref<1x2x128xf32, #tpu.memory_space<vmem>>, vector<1x2x128xf32>
    %27 = vector.shape_cast %26 : vector<1x2x128xf32> to vector<2x128xf32>
    %28 = vector.shape_cast %25 : vector<2x128xf32> to vector<1x2x128xf32>
    tpu.vector_store %arg6[%c0_12, %c0_13, %c0_14], %28 {strides = array<i32>} : memref<1x2x128xf32, #tpu.memory_space<vmem>>, vector<1x2x128xf32>,
    return
  }
  func.func @transform_0(%arg0: i32) -> (i32, i32) {
    %c0_i32 = arith.constant 0 : i32
    %c0_i32_0 = arith.constant 0 : i32
    return %arg0, %c0_i32 : i32, i32
  }
  func.func @transform_1(%arg0: i32) -> (i32, i32) {
    %c0_i32 = arith.constant 0 : i32
    %c0_i32_0 = arith.constant 0 : i32
    %c0_i32_1 = arith.constant 0 : i32
    return %c0_i32, %c0_i32_0 : i32, i32
  }
  func.func @transform_2(%arg0: i32) -> (i32, i32) {
    %c0_i32 = arith.constant 0 : i32
    %c0_i32_0 = arith.constant 0 : i32
    %c0_i32_1 = arith.constant 0 : i32
    return %c0_i32, %c0_i32_0 : i32, i32
  }
  func.func @transform_3(%arg0: i32) -> (i32, i32) {
    %c0_i32 = arith.constant 0 : i32
    %c0_i32_0 = arith.constant 0 : i32
    %c0_i32_1 = arith.constant 0 : i32
    return %c0_i32, %c0_i32_0 : i32, i32
  }
  func.func @transform_4(%arg0: i32) -> (i32, i32) {
    %c0_i32 = arith.constant 0 : i32
    %c0_i32_0 = arith.constant 0 : i32
    return %arg0, %c0_i32 : i32, i32
  }
  func.func @transform_5(%arg0: i32) -> (i32, i32, i32) {
    %c0_i32 = arith.constant 0 : i32
    %c0_i32_0 = arith.constant 0 : i32
    %c0_i32_1 = arith.constant 0 : i32
    return %arg0, %c0_i32, %c0_i32_0 : i32, i32, i32
  }
}

module attributes {stable_mosaic.version = 11 : i64} {
  func.func @_deconv_kernel(%arg0: i32, %arg1: memref<32x288xf32, #tpu.memory_space<vmem>>, %arg2: memref<288x128xbf16, #tpu.memory_space<vmem>>, %arg3: memref<1x288xf32, #tpu.memory_space<vmem>>, %arg4: memref<1x288xf32, #tpu.memory_space<vmem>>, %arg5: memref<32x128xf32, #tpu.memory_space<vmem>>, %arg6: memref<1x2x128xf32, #tpu.memory_space<vmem>>) attributes {dimension_semantics = [#tpu.dimension_semantics<parallel>], iteration_bounds = array<i64: 1>, scalar_prefetch = 0 : i64, scratch_operands = 0 : i64, tpu.core_type = #tpu.core_type<tc>, window_params = [{transform_indices = @transform_0, window_bounds = array<i64: 32, 288>}, {pipeline_mode = #tpu.pipeline_mode<synchronous>, transform_indices = @transform_1, window_bounds = array<i64: 288, 128>}, {pipeline_mode = #tpu.pipeline_mode<synchronous>, transform_indices = @transform_2, window_bounds = array<i64: 1, 288>}, {pipeline_mode = #tpu.pipeline_mode<synchronous>, transform_indices = @transform_3, window_bounds = array<i64: 1, 288>}, {transform_indices = @transform_4, window_bounds = array<i64: 32, 128>}, {transform_indices = @transform_5, window_bounds = array<i64: 1, 2, 128>}]} {
    %c0 = arith.constant 0 : index
    %c0_0 = arith.constant 0 : index
    %0 = vector.load %arg1[%c0, %c0_0] : memref<32x288xf32, #tpu.memory_space<vmem>>, vector<32x288xf32>
    %c0_1 = arith.constant 0 : index
    %c0_2 = arith.constant 0 : index
    %1 = vector.load %arg3[%c0_1, %c0_2] : memref<1x288xf32, #tpu.memory_space<vmem>>, vector<1x288xf32>
    %2 = vector.broadcast %1 : vector<1x288xf32> to vector<32x288xf32>
    %3 = arith.mulf %0, %2 : vector<32x288xf32>
    %c0_3 = arith.constant 0 : index
    %c0_4 = arith.constant 0 : index
    %4 = vector.load %arg4[%c0_3, %c0_4] : memref<1x288xf32, #tpu.memory_space<vmem>>, vector<1x288xf32>
    %5 = vector.broadcast %4 : vector<1x288xf32> to vector<32x288xf32>
    %6 = arith.addf %3, %5 : vector<32x288xf32>
    %cst = arith.constant 0.000000e+00 : f32
    %7 = vector.broadcast %cst : f32 to vector<32x288xf32>
    %8 = arith.maximumf %6, %7 : vector<32x288xf32>
    %9 = arith.truncf %8 : vector<32x288xf32> to vector<32x288xbf16>
    %c0_5 = arith.constant 0 : index
    %c0_6 = arith.constant 0 : index
    %10 = vector.load %arg2[%c0_5, %c0_6] : memref<288x128xbf16, #tpu.memory_space<vmem>>, vector<288x128xbf16>
    %cst_7 = arith.constant dense<0.000000e+00> : vector<32x128xf32>
    %11 = tpu.matmul %9, %10, %cst_7 {dimension_numbers = #tpu.dot_dimension_numbers<[1], [0], [0], [1], [0, 0, 1, 1], [], []>} : vector<32x288xbf16>, vector<288x128xbf16>, vector<32x128xf32> -> vector<32x128xf32>
    %c0_8 = arith.constant 0 : index
    %c0_9 = arith.constant 0 : index
    %12 = vector.load %arg5[%c0_8, %c0_9] : memref<32x128xf32, #tpu.memory_space<vmem>>, vector<32x128xf32>
    tpu.vector_store %arg5[%c0_8, %c0_9], %11 {strides = array<i32>} : memref<32x128xf32, #tpu.memory_space<vmem>>, vector<32x128xf32>,
    %cst_10 = arith.constant dense<0.000000e+00> : vector<128xf32>
    %13 = vector.multi_reduction <add>, %11, %cst_10 [0] : vector<32x128xf32> to vector<128xf32>
    %14 = vector.shape_cast %13 : vector<128xf32> to vector<1x128xf32>
    %15 = arith.mulf %11, %11 : vector<32x128xf32>
    %cst_11 = arith.constant dense<0.000000e+00> : vector<128xf32>
    %16 = vector.multi_reduction <add>, %15, %cst_11 [0] : vector<32x128xf32> to vector<128xf32>
    %17 = vector.shape_cast %16 : vector<128xf32> to vector<1x128xf32>
    %18 = tpu.iota {dimensions = array<i32: 0>} : vector<2x128xi32>
    %c0_i32 = arith.constant 0 : i32
    %19 = vector.broadcast %c0_i32 : i32 to vector<2x128xi32>
    %20 = arith.cmpi eq, %18, %19 : vector<2x128xi32>
    %21 = vector.shape_cast %14 : vector<1x128xf32> to vector<1x128xf32>
    %22 = vector.broadcast %21 : vector<1x128xf32> to vector<2x128xf32>
    %23 = vector.shape_cast %17 : vector<1x128xf32> to vector<1x128xf32>
    %24 = vector.broadcast %23 : vector<1x128xf32> to vector<2x128xf32>
    %25 = arith.select %20, %22, %24 : vector<2x128xi1>, vector<2x128xf32>
    %c0_12 = arith.constant 0 : index
    %c0_13 = arith.constant 0 : index
    %c0_14 = arith.constant 0 : index
    %26 = vector.load %arg6[%c0_12, %c0_13, %c0_14] : memref<1x2x128xf32, #tpu.memory_space<vmem>>, vector<1x2x128xf32>
    %27 = vector.shape_cast %26 : vector<1x2x128xf32> to vector<2x128xf32>
    %28 = vector.shape_cast %25 : vector<2x128xf32> to vector<1x2x128xf32>
    tpu.vector_store %arg6[%c0_12, %c0_13, %c0_14], %28 {strides = array<i32>} : memref<1x2x128xf32, #tpu.memory_space<vmem>>, vector<1x2x128xf32>,
    return
  }
  func.func @transform_0(%arg0: i32) -> (i32, i32) {
    %c0_i32 = arith.constant 0 : i32
    %c0_i32_0 = arith.constant 0 : i32
    return %arg0, %c0_i32 : i32, i32
  }
  func.func @transform_1(%arg0: i32) -> (i32, i32) {
    %c0_i32 = arith.constant 0 : i32
    %c0_i32_0 = arith.constant 0 : i32
    %c0_i32_1 = arith.constant 0 : i32
    return %c0_i32, %c0_i32_0 : i32, i32
  }
  func.func @transform_2(%arg0: i32) -> (i32, i32) {
    %c0_i32 = arith.constant 0 : i32
    %c0_i32_0 = arith.constant 0 : i32
    %c0_i32_1 = arith.constant 0 : i32
    return %c0_i32, %c0_i32_0 : i32, i32
  }
  func.func @transform_3(%arg0: i32) -> (i32, i32) {
    %c0_i32 = arith.constant 0 : i32
    %c0_i32_0 = arith.constant 0 : i32
    %c0_i32_1 = arith.constant 0 : i32
    return %c0_i32, %c0_i32_0 : i32, i32
  }
  func.func @transform_4(%arg0: i32) -> (i32, i32) {
    %c0_i32 = arith.constant 0 : i32
    %c0_i32_0 = arith.constant 0 : i32
    return %arg0, %c0_i32 : i32, i32
  }
  func.func @transform_5(%arg0: i32) -> (i32, i32, i32) {
    %c0_i32 = arith.constant 0 : i32
    %c0_i32_0 = arith.constant 0 : i32
    %c0_i32_1 = arith.constant 0 : i32
    return %arg0, %c0_i32, %c0_i32_0 : i32, i32, i32
  }
}

module attributes {stable_mosaic.version = 11 : i64} {
  func.func @_affine_kernel(%arg0: i32, %arg1: memref<32x128xf32, #tpu.memory_space<vmem>>, %arg2: memref<1x128xf32, #tpu.memory_space<vmem>>, %arg3: memref<1x128xf32, #tpu.memory_space<vmem>>, %arg4: memref<32x128xf32, #tpu.memory_space<vmem>>) attributes {dimension_semantics = [#tpu.dimension_semantics<parallel>], iteration_bounds = array<i64: 1>, scalar_prefetch = 0 : i64, scratch_operands = 0 : i64, tpu.core_type = #tpu.core_type<tc>, window_params = [{transform_indices = @transform_0, window_bounds = array<i64: 32, 128>}, {pipeline_mode = #tpu.pipeline_mode<synchronous>, transform_indices = @transform_1, window_bounds = array<i64: 1, 128>}, {pipeline_mode = #tpu.pipeline_mode<synchronous>, transform_indices = @transform_2, window_bounds = array<i64: 1, 128>}, {transform_indices = @transform_3, window_bounds = array<i64: 32, 128>}]} {
    %c0 = arith.constant 0 : index
    %c0_0 = arith.constant 0 : index
    %0 = vector.load %arg1[%c0, %c0_0] : memref<32x128xf32, #tpu.memory_space<vmem>>, vector<32x128xf32>
    %c0_1 = arith.constant 0 : index
    %c0_2 = arith.constant 0 : index
    %1 = vector.load %arg2[%c0_1, %c0_2] : memref<1x128xf32, #tpu.memory_space<vmem>>, vector<1x128xf32>
    %2 = vector.broadcast %1 : vector<1x128xf32> to vector<32x128xf32>
    %3 = arith.mulf %0, %2 : vector<32x128xf32>
    %c0_3 = arith.constant 0 : index
    %c0_4 = arith.constant 0 : index
    %4 = vector.load %arg3[%c0_3, %c0_4] : memref<1x128xf32, #tpu.memory_space<vmem>>, vector<1x128xf32>
    %5 = vector.broadcast %4 : vector<1x128xf32> to vector<32x128xf32>
    %6 = arith.addf %3, %5 : vector<32x128xf32>
    %c0_5 = arith.constant 0 : index
    %c0_6 = arith.constant 0 : index
    %7 = vector.load %arg4[%c0_5, %c0_6] : memref<32x128xf32, #tpu.memory_space<vmem>>, vector<32x128xf32>
    tpu.vector_store %arg4[%c0_5, %c0_6], %6 {strides = array<i32>} : memref<32x128xf32, #tpu.memory_space<vmem>>, vector<32x128xf32>,
    return
  }
  func.func @transform_0(%arg0: i32) -> (i32, i32) {
    %c0_i32 = arith.constant 0 : i32
    %c0_i32_0 = arith.constant 0 : i32
    return %arg0, %c0_i32 : i32, i32
  }
  func.func @transform_1(%arg0: i32) -> (i32, i32) {
    %c0_i32 = arith.constant 0 : i32
    %c0_i32_0 = arith.constant 0 : i32
    %c0_i32_1 = arith.constant 0 : i32
    return %c0_i32, %c0_i32_0 : i32, i32
  }
  func.func @transform_2(%arg0: i32) -> (i32, i32) {
    %c0_i32 = arith.constant 0 : i32
    %c0_i32_0 = arith.constant 0 : i32
    %c0_i32_1 = arith.constant 0 : i32
    return %c0_i32, %c0_i32_0 : i32, i32
  }
  func.func @transform_3(%arg0: i32) -> (i32, i32) {
    %c0_i32 = arith.constant 0 : i32
    %c0_i32_0 = arith.constant 0 : i32
    return %arg0, %c0_i32 : i32, i32
  }
}

module attributes {stable_mosaic.version = 11 : i64} {
  func.func @_deconv_kernel(%arg0: i32, %arg1: memref<128x288xf32, #tpu.memory_space<vmem>>, %arg2: memref<288x128xbf16, #tpu.memory_space<vmem>>, %arg3: memref<1x128xf32, #tpu.memory_space<vmem>>, %arg4: memref<128x128xf32, #tpu.memory_space<vmem>>) attributes {dimension_semantics = [#tpu.dimension_semantics<parallel>], iteration_bounds = array<i64: 1>, scalar_prefetch = 0 : i64, scratch_operands = 0 : i64, tpu.core_type = #tpu.core_type<tc>, window_params = [{transform_indices = @transform_0, window_bounds = array<i64: 128, 288>}, {pipeline_mode = #tpu.pipeline_mode<synchronous>, transform_indices = @transform_1, window_bounds = array<i64: 288, 128>}, {pipeline_mode = #tpu.pipeline_mode<synchronous>, transform_indices = @transform_2, window_bounds = array<i64: 1, 128>}, {transform_indices = @transform_3, window_bounds = array<i64: 128, 128>}]} {
    %c0 = arith.constant 0 : index
    %c0_0 = arith.constant 0 : index
    %0 = vector.load %arg1[%c0, %c0_0] : memref<128x288xf32, #tpu.memory_space<vmem>>, vector<128x288xf32>
    %cst = arith.constant 0.000000e+00 : f32
    %1 = vector.broadcast %cst : f32 to vector<128x288xf32>
    %2 = arith.maximumf %0, %1 : vector<128x288xf32>
    %3 = arith.truncf %2 : vector<128x288xf32> to vector<128x288xbf16>
    %c0_1 = arith.constant 0 : index
    %c0_2 = arith.constant 0 : index
    %4 = vector.load %arg2[%c0_1, %c0_2] : memref<288x128xbf16, #tpu.memory_space<vmem>>, vector<288x128xbf16>
    %cst_3 = arith.constant dense<0.000000e+00> : vector<128x128xf32>
    %5 = tpu.matmul %3, %4, %cst_3 {dimension_numbers = #tpu.dot_dimension_numbers<[1], [0], [0], [1], [0, 0, 1, 1], [], []>} : vector<128x288xbf16>, vector<288x128xbf16>, vector<128x128xf32> -> vector<128x128xf32>
    %c0_4 = arith.constant 0 : index
    %c0_5 = arith.constant 0 : index
    %6 = vector.load %arg3[%c0_4, %c0_5] : memref<1x128xf32, #tpu.memory_space<vmem>>, vector<1x128xf32>
    %7 = vector.broadcast %6 : vector<1x128xf32> to vector<128x128xf32>
    %8 = arith.addf %5, %7 : vector<128x128xf32>
    %c0_6 = arith.constant 0 : index
    %c0_7 = arith.constant 0 : index
    %9 = vector.load %arg4[%c0_6, %c0_7] : memref<128x128xf32, #tpu.memory_space<vmem>>, vector<128x128xf32>
    tpu.vector_store %arg4[%c0_6, %c0_7], %8 {strides = array<i32>} : memref<128x128xf32, #tpu.memory_space<vmem>>, vector<128x128xf32>,
    return
  }
  func.func @transform_0(%arg0: i32) -> (i32, i32) {
    %c0_i32 = arith.constant 0 : i32
    %c0_i32_0 = arith.constant 0 : i32
    return %arg0, %c0_i32 : i32, i32
  }
  func.func @transform_1(%arg0: i32) -> (i32, i32) {
    %c0_i32 = arith.constant 0 : i32
    %c0_i32_0 = arith.constant 0 : i32
    %c0_i32_1 = arith.constant 0 : i32
    return %c0_i32, %c0_i32_0 : i32, i32
  }
  func.func @transform_2(%arg0: i32) -> (i32, i32) {
    %c0_i32 = arith.constant 0 : i32
    %c0_i32_0 = arith.constant 0 : i32
    %c0_i32_1 = arith.constant 0 : i32
    return %c0_i32, %c0_i32_0 : i32, i32
  }
  func.func @transform_3(%arg0: i32) -> (i32, i32) {
    %c0_i32 = arith.constant 0 : i32
    %c0_i32_0 = arith.constant 0 : i32
    return %arg0, %c0_i32 : i32, i32
  }
}

</mosaic_0001>

<bundles_post_ra>
// kernel: squeeze.6
= control target key start
LH: loop header
LB: loop body
LE: loop exit
PB: predicated region body
PF: predicated region fallthrough
CT: control target
= control target key end

     0   :  { %vm7_vm0 = vcmask 523264   ;;  %s39_s0 = inlined_call_operand.vmem [shape: f32[256], index: 0, kind: input, shape index: {}]   ;;  %s40_s1 = inlined_call_operand.vmem [shape: f32[4,64], index: 1, kind: output, shape index: {}]  }
   0x1   :  { %v4_v0 = vld [vmem:[%s39_s0] sm:$0x3]  ;;  %s22_s0 = smov 64  }
   0x2   :  { %5 = vst [vmem:[#allocation1] sm:$0x3] %v4_v0 }
   0x9   :  { %v9_v1 = vld [vmem:[#allocation1] sm:$0x3]  }
   0xa   :  { %v6_v2 = vld [vmem:[#allocation1] sm:$0x3]   ;;  %10 = vrot.lane.b32.xlu0 %v9_v1, %s22_s0 }
   0xb   :  { %8 = vst.msk [vmem:[#allocation0] ss:$2 sm:$0x3] %vm7_vm0, %v6_v2  }
  0x7c   :  { %v11_v3 = vpop.permute.xlu0 %10  }
  0x7d   :  { %14 = vst.msk [vmem:[#allocation0 + $0x1] ss:$2 sm:$0x3] %vm7_vm0, %v11_v3  }
  0x84   :  { %v17_v4 = vld [vmem:[#allocation0] sm:$0xf] }
  0x85   :  { %20 = vst [vmem:[%s40_s1] sm:$0xf] %v17_v4 }

// kernel: conditional_decoder_forward.6
= control target key start
LH: loop header
LB: loop body
LE: loop exit
PB: predicated region body
PF: predicated region fallthrough
CT: control target
= control target key end

     0   :  { %8 = vsyncpa [#allocation3], 0  ;;  %s104_s15 = smov [#allocation2]   ;;  %s105_s17 = smov 128   ;;  %s139_s0 = inlined_call_operand.vmem [shape: f32[2,12], index: 0, kind: input, shape index: {}]   ;;  %s140_s1 = inlined_call_operand.hbm [shape: f32[12,128], index: 1, kind: input, shape index: {}]   ;;  %s141_s2 = inlined_call_operand.vmem [shape: f32[1,128], index: 2, kind: input, shape index: {}]   ;;  %s142_s3 = inlined_call_operand.vmem [shape: f32[2,128], index: 3, kind: output, shape index: {}]  }
   0x1   :  { %s15_s14 = sshll.u32 %s140_s1, 4  ;;  %s17_s16 = sshll.u32 %s104_s15, 4  ;;  %s16_s14 = int_to_ptr.hbm [resolvable:$true] %s15_s14  ;;  %s18_s16 = int_to_ptr.vmem [resolvable:$true] %s17_s16 }
   0x2   :  { %s106_s18 = smov 8  }
   0x3   :  { %23 = dma.hbm_to_vmem [thread:$0]  %s16_s14, 256, %s18_s16, [#allocation3], %s105_s17, %s105_s17, %s106_s18  }
   0x4   :  { %102 = dma.done.wait [#allocation3], 256  }
   0x5   :  { %103 = vsyncadd [#allocation3], 4294967040  ;;  %vm41_vm0 = vcmask 1043456   ;;  %v32_v0 = vld [vmem:[#allocation2 + $0x8] sm:$0xf]  ;;  %v31_v1 = vld [vmem:[#allocation2] sm:$0xff] }
   0x6   :  { %72 = vmatpush.msk.msra.mxu0 %vm41_vm0, %v32_v0  ;;  %v30_v2 = vld [vmem:[%s139_s0] sm:$0x3]  ;;  %vm37_vm1 = vcmask 97280  }
   0x7   :  { %v77_v3 = vld [vmem:[%s141_s2] ss:$0 sm:$0xff] }
   0x8   :  { %60 = vmatpush.msra.mxu0 %v31_v1 }
   0x9   :  { %73 = vmatmul.msk.f32.vlgmr.msra.gmra.mxu0 %vm37_vm1, %v30_v2 }
  0x86   :  { %v62_v4 = vpop.f32.mrf.mxu0 }
  0x87   :  { %v63_v5 = vadd.f32 %v77_v3, %v62_v4 }
  0x89   :  { %v65_v6 = vmax.f32 %v63_v5, 0.0 }
  0x8b   :  { %66 = vst [vmem:[%s142_s3] sm:$0x3] %v65_v6 }
  0x8c   :  { %71 = vsyncpa [#allocation3], 1 }

// kernel: squeeze.8
= control target key start
LH: loop header
LB: loop body
LE: loop exit
PB: predicated region body
PF: predicated region fallthrough
CT: control target
= control target key end

     0   :  { %s37_s8 = smov 32   ;;  %s38_s9 = smov 64   ;;  %vm7_vm0 = vcmask 261120   ;;  %s55_s0 = inlined_call_operand.vmem [shape: f32[128], index: 0, kind: input, shape index: {}]   ;;  %s56_s1 = inlined_call_operand.vmem [shape: f32[4,32], index: 1, kind: output, shape index: {}]  }
   0x1   :  { %v4_v0 = vld [vmem:[%s55_s0] sm:$0x1]  ;;  %s36_s0 = smov 96  }
   0x2   :  { %5 = vst [vmem:[#allocation1] sm:$0x1] %v4_v0 }
   0x9   :  { %v9_v1 = vld [vmem:[#allocation1] sm:$0x1]  }
   0xa   :  { %v21_v2 = vld [vmem:[#allocation1] sm:$0x1]   ;;  %10 = vrot.lane.b32.xlu0 %v9_v1, %s36_s0 }
   0xb   :  { %22 = vrot.lane.b32.xlu1 %v21_v2, %s37_s8  ;;  %v15_v3 = vld [vmem:[#allocation1] sm:$0x1]  }
   0xc   :  { %v6_v4 = vld [vmem:[#allocation1] sm:$0x1]  }
   0xd   :  { %8 = vst.msk [vmem:[#allocation0] sm:$0x1] %vm7_vm0, %v6_v4  }
  0x12   :  { %16 = vrot.lane.b32.xlu0 %v15_v3, %s38_s9 }
  0x7c   :  { %v11_v5 = vpop.permute.xlu0 %10  }
  0x7d   :  { %v23_v6 = vpop.permute.xlu1 %22   ;;  %14 = vst.msk [vmem:[#allocation0 + $0x1] sm:$0x1] %vm7_vm0, %v11_v5  }
  0x7e   :  { %26 = vst.msk [vmem:[#allocation0 + $0x3] sm:$0x1] %vm7_vm0, %v23_v6  }
  0x84   :  { %v17_v7 = vpop.permute.xlu0 %16  }
  0x85   :  { %20 = vst.msk [vmem:[#allocation0 + $0x2] sm:$0x1] %vm7_vm0, %v17_v7  }
  0x8c   :  { %v29_v8 = vld [vmem:[#allocation0] sm:$0xf] }
  0x8d   :  { %32 = vst [vmem:[%s56_s1] sm:$0xf] %v29_v8 }

// kernel: conditional_decoder_forward.7
= control target key start
LH: loop header
LB: loop body
LE: loop exit
PB: predicated region body
PF: predicated region fallthrough
CT: control target
= control target key end

     0   :  { %9 = vsyncpa [#allocation3], 0  ;;  %s1066_s15 = smov [#allocation2]   ;;  %s1067_s17 = smov 128   ;;  %s1132_s0 = inlined_call_operand.vmem [shape: f32[2,576], index: 0, kind: input, shape index: {}]   ;;  %s1133_s1 = inlined_call_operand.hbm [shape: bf16[576,256], index: 1, kind: input, shape index: {}]   ;;  %s1134_s2 = inlined_call_operand.vmem [shape: f32[2,256], index: 2, kind: output, shape index: {0}]   ;;  %s1135_s3 = inlined_call_operand.vmem [shape: f32[1,2,256], index: 3, kind: output, shape index: {1}]  }
   0x1   :  { %s16_s14 = sshll.u32 %s1133_s1, 4  ;;  %s18_s16 = sshll.u32 %s1066_s15, 4  ;;  %s17_s14 = int_to_ptr.hbm [resolvable:$true] %s16_s14  ;;  %s19_s16 = int_to_ptr.vmem [resolvable:$true] %s18_s16 }
   0x2   :  { %s1068_s18 = smov 8  }
   0x3   :  { %24 = dma.hbm_to_vmem [thread:$0]  %s17_s14, 9216, %s19_s16, [#allocation3], %s1067_s17, %s1067_s17, %s1068_s18  }
   0x4   :  { %1064 = dma.done.wait [#allocation3], 9216  }
   0x5   :  { %1065 = vsyncadd [#allocation3], 4294958080  ;;  %v733_v0 = vld [vmem:[#allocation2 + $0x70] sm:$0xf]  ;;  %v980_v1 = vld [vmem:[#allocation2 + $0x74] sm:$0xf0] }
   0x6   :  { %v797_v2 = vld [vmem:[#allocation2 + $0xf0] sm:$0xf]  ;;  %v734_v3 = vor.u32 %v980_v1, %v733_v0  ;;  %v996_v4 = vld [vmem:[#allocation2 + $0xf4] sm:$0xf0]  ;;  %v725_v11 = vld [vmem:[#allocation2 + $0x60] sm:$0xf] }
   0x7   :  { %v861_v5 = vld [vmem:[#allocation2 + $0x170] sm:$0xf]  ;;  %v1012_v6 = vld [vmem:[#allocation2 + $0x174] sm:$0xf0]  ;;  %v798_v7 = vor.u32 %v996_v4, %v797_v2  ;;  %v978_v13 = vld [vmem:[#allocation2 + $0x64] sm:$0xf0] }
   0x8   :  { %v862_v8 = vor.u32 %v1012_v6, %v861_v5  ;;  %v925_v9 = vld [vmem:[#allocation2 + $0x1f0] sm:$0xf]  ;;  %v1028_v10 = vld [vmem:[#allocation2 + $0x1f4] sm:$0xf0]  ;;  %488 = vmatpush.bf16.msra.mxu0 %v734_v3  ;;  %v789_v14 = vld [vmem:[#allocation2 + $0xe0] sm:$0xf]  ;;  %v726_v16 = vor.u32 %v978_v13, %v725_v11 }
   0x9   :  { %v926_v12 = vor.u32 %v1028_v10, %v925_v9  ;;  %v994_v15 = vld [vmem:[#allocation2 + $0xe4] sm:$0xf0]  ;;  %501 = vmatpush.bf16.msra.mxu1 %v798_v7  ;;  %v853_v18 = vld [vmem:[#allocation2 + $0x160] sm:$0xf]  ;;  %v717_v23 = vld [vmem:[#allocation2 + $0x50] sm:$0xf] }
   0xa   :  { %514 = vmatpush.bf16.msra.mxu2 %v862_v8  ;;  %v790_v17 = vor.u32 %v994_v15, %v789_v14  ;;  %v1010_v19 = vld [vmem:[#allocation2 + $0x164] sm:$0xf0]  ;;  %v917_v20 = vld [vmem:[#allocation2 + $0x1e0] sm:$0xf]  ;;  %v976_v24 = vld [vmem:[#allocation2 + $0x54] sm:$0xf0] }
   0xb   :  { %527 = vmatpush.bf16.msra.mxu3 %v926_v12  ;;  %v854_v21 = vor.u32 %v1010_v19, %v853_v18  ;;  %v1026_v22 = vld [vmem:[#allocation2 + $0x1e4] sm:$0xf0]  ;;  %v781_v26 = vld [vmem:[#allocation2 + $0xd0] sm:$0xf]  ;;  %v992_v27 = vld [vmem:[#allocation2 + $0xd4] sm:$0xf0]  ;;  %v718_v29 = vor.u32 %v976_v24, %v717_v23 }
   0xc   :  { %v918_v25 = vor.u32 %v1026_v22, %v917_v20  ;;  %v845_v28 = vld [vmem:[#allocation2 + $0x150] sm:$0xf]  ;;  %489 = vmatpush.bf16.msra.mxu0 %v726_v16  ;;  %v1008_v30 = vld [vmem:[#allocation2 + $0x154] sm:$0xf0]  ;;  %v782_v33 = vor.u32 %v992_v27, %v781_v26  ;;  %v709_v35 = vld [vmem:[#allocation2 + $0x40] sm:$0xf] }
   0xd   :  { %v909_v31 = vld [vmem:[#allocation2 + $0x1d0] sm:$0xf]  ;;  %v1024_v32 = vld [vmem:[#allocation2 + $0x1d4] sm:$0xf0]  ;;  %502 = vmatpush.bf16.msra.mxu1 %v790_v17  ;;  %v846_v34 = vor.u32 %v1008_v30, %v845_v28  ;;  %v974_v36 = vld [vmem:[#allocation2 + $0x44] sm:$0xf0] }
   0xe   :  { %515 = vmatpush.bf16.msra.mxu2 %v854_v21  ;;  %v773_v37 = vld [vmem:[#allocation2 + $0xc0] sm:$0xf]  ;;  %v910_v38 = vor.u32 %v1024_v32, %v909_v31  ;;  %v990_v39 = vld [vmem:[#allocation2 + $0xc4] sm:$0xf0]  ;;  %v710_v44 = vor.u32 %v974_v36, %v709_v35  ;;  %v701_v47 = vld [vmem:[#allocation2 + $0x30] sm:$0xf] }
   0xf   :  { %528 = vmatpush.bf16.msra.mxu3 %v918_v25  ;;  %v837_v40 = vld [vmem:[#allocation2 + $0x140] sm:$0xf]  ;;  %v1006_v41 = vld [vmem:[#allocation2 + $0x144] sm:$0xf0]  ;;  %v774_v45 = vor.u32 %v990_v39, %v773_v37  ;;  %v972_v48 = vld [vmem:[#allocation2 + $0x34] sm:$0xf0] }
  0x10   :  { %v901_v42 = vld [vmem:[#allocation2 + $0x1c0] sm:$0xf]  ;;  %v1022_v43 = vld [vmem:[#allocation2 + $0x1c4] sm:$0xf0]  ;;  %490 = vmatpush.bf16.msra.mxu0 %v718_v29  ;;  %v838_v46 = vor.u32 %v1006_v41, %v837_v40  ;;  %v765_v49 = vld [vmem:[#allocation2 + $0xb0] sm:$0xf]  ;;  %v702_v56 = vor.u32 %v972_v48, %v701_v47 }
  0x11   :  { %503 = vmatpush.bf16.msra.mxu1 %v782_v33  ;;  %v902_v50 = vor.u32 %v1022_v43, %v901_v42  ;;  %v988_v51 = vld [vmem:[#allocation2 + $0xb4] sm:$0xf0]  ;;  %v829_v52 = vld [vmem:[#allocation2 + $0x130] sm:$0xf]  ;;  %v693_v59 = vld [vmem:[#allocation2 + $0x20] sm:$0xf] }
  0x12   :  { %516 = vmatpush.bf16.msra.mxu2 %v846_v34  ;;  %v1004_v53 = vld [vmem:[#allocation2 + $0x134] sm:$0xf0]  ;;  %v893_v54 = vld [vmem:[#allocation2 + $0x1b0] sm:$0xf]  ;;  %v766_v57 = vor.u32 %v988_v51, %v765_v49  ;;  %v970_v60 = vld [vmem:[#allocation2 + $0x24] sm:$0xf0] }
  0x13   :  { %529 = vmatpush.bf16.msra.mxu3 %v910_v38  ;;  %v1020_v55 = vld [vmem:[#allocation2 + $0x1b4] sm:$0xf0]  ;;  %v830_v58 = vor.u32 %v1004_v53, %v829_v52  ;;  %v757_v61 = vld [vmem:[#allocation2 + $0xa0] sm:$0xf]  ;;  %v986_v63 = vld [vmem:[#allocation2 + $0xa4] sm:$0xf0]  ;;  %v694_v4 = vor.u32 %v970_v60, %v693_v59 }
  0x14   :  { %491 = vmatpush.bf16.msra.mxu0 %v710_v44  ;;  %v894_v62 = vor.u32 %v1020_v55, %v893_v54  ;;  %v821_v0 = vld [vmem:[#allocation2 + $0x120] sm:$0xf]  ;;  %v1002_v1 = vld [vmem:[#allocation2 + $0x124] sm:$0xf0]  ;;  %v758_v5 = vor.u32 %v986_v63, %v757_v61  ;;  %v685_v7 = vld [vmem:[#allocation2 + $0x10] sm:$0xf] }
  0x15   :  { %504 = vmatpush.bf16.msra.mxu1 %v774_v45  ;;  %v885_v2 = vld [vmem:[#allocation2 + $0x1a0] sm:$0xf]  ;;  %v1018_v3 = vld [vmem:[#allocation2 + $0x1a4] sm:$0xf0]  ;;  %v822_v6 = vor.u32 %v1002_v1, %v821_v0  ;;  %v968_v8 = vld [vmem:[#allocation2 + $0x14] sm:$0xf0] }
  0x16   :  { %517 = vmatpush.bf16.msra.mxu2 %v838_v46  ;;  %v749_v9 = vld [vmem:[#allocation2 + $0x90] sm:$0xf]  ;;  %v886_v10 = vor.u32 %v1018_v3, %v885_v2  ;;  %v984_v11 = vld [vmem:[#allocation2 + $0x94] sm:$0xf0]  ;;  %v677_v16 = vld [vmem:[#allocation2] sm:$0xf]  ;;  %v686_v17 = vor.u32 %v968_v8, %v685_v7 }
  0x17   :  { %530 = vmatpush.bf16.msra.mxu3 %v902_v50  ;;  %v813_v12 = vld [vmem:[#allocation2 + $0x110] sm:$0xf]  ;;  %v1000_v13 = vld [vmem:[#allocation2 + $0x114] sm:$0xf0]  ;;  %v966_v18 = vld [vmem:[#allocation2 + $0x4] sm:$0xf0]  ;;  %v750_v21 = vor.u32 %v984_v11, %v749_v9 }
  0x18   :  { %492 = vmatpush.bf16.msra.mxu0 %v702_v56  ;;  %v877_v14 = vld [vmem:[#allocation2 + $0x190] sm:$0xf]  ;;  %v1016_v15 = vld [vmem:[#allocation2 + $0x194] sm:$0xf0]  ;;  %v741_v19 = vld [vmem:[#allocation2 + $0x80] sm:$0xf]  ;;  %v814_v22 = vor.u32 %v1000_v13, %v813_v12  ;;  %v678_v32 = vor.u32 %v966_v18, %v677_v16 }
  0x19   :  { %505 = vmatpush.bf16.msra.mxu1 %v766_v57  ;;  %v982_v20 = vld [vmem:[#allocation2 + $0x84] sm:$0xf0]  ;;  %v805_v23 = vld [vmem:[#allocation2 + $0x100] sm:$0xf]  ;;  %v30_v25 = vld [vmem:[%s1132_s0] sm:$0xff]  ;;  %v878_v26 = vor.u32 %v1016_v15, %v877_v14  ;;  %vm484_vm0 = vcmask 523264  }
  0x1a   :  { %518 = vmatpush.bf16.msra.mxu2 %v830_v58  ;;  %v998_v24 = vld [vmem:[#allocation2 + $0x104] sm:$0xf0]  ;;  %v869_v27 = vld [vmem:[#allocation2 + $0x180] sm:$0xf]  ;;  %34 = vst [vmem:[#allocation1] ss:$4 sm:$0xff] %v30_v25  ;;  %v742_v36 = vor.u32 %v982_v20, %v741_v19 }
  0x1b   :  { %531 = vmatpush.bf16.msra.mxu3 %v894_v62  ;;  %v1014_v28 = vld [vmem:[#allocation2 + $0x184] sm:$0xf0]  ;;  %v957_v29 = vld [vmem:[#allocation2 + $0x230] sm:$0xf]  ;;  %v1036_v30 = vld [vmem:[#allocation2 + $0x234] sm:$0xf0]  ;;  %v806_v37 = vor.u32 %v998_v24, %v805_v23 }
  0x1c   :  { %493 = vmatpush.bf16.msra.mxu0 %v694_v4  ;;  %v979_v31 = vld [vmem:[#allocation2 + $0x74] sm:$0xf]  ;;  %v735_v33 = vld [vmem:[#allocation2 + $0x78] sm:$0xf0]  ;;  %v870_v40 = vor.u32 %v1014_v28, %v869_v27  ;;  %v958_v41 = vor.u32 %v1036_v30, %v957_v29  ;;  %v949_v42 = vld [vmem:[#allocation2 + $0x220] sm:$0xf] }
  0x1d   :  { %506 = vmatpush.bf16.msra.mxu1 %v758_v5  ;;  %v995_v34 = vld [vmem:[#allocation2 + $0xf4] sm:$0xf]  ;;  %v799_v35 = vld [vmem:[#allocation2 + $0xf8] sm:$0xf0]  ;;  %v1034_v43 = vld [vmem:[#allocation2 + $0x224] sm:$0xf0]  ;;  %v738_v44 = vor.u32 %v979_v31, %v735_v33 }
  0x1e   :  { %519 = vmatpush.bf16.msra.mxu2 %v822_v6  ;;  %v1011_v38 = vld [vmem:[#allocation2 + $0x174] sm:$0xf]  ;;  %v863_v39 = vld [vmem:[#allocation2 + $0x178] sm:$0xf0]  ;;  %v802_v45 = vor.u32 %v995_v34, %v799_v35  ;;  %v977_v46 = vld [vmem:[#allocation2 + $0x64] sm:$0xf]  ;;  %v950_v54 = vor.u32 %v1034_v43, %v949_v42 }
  0x1f   :  { %532 = vmatpush.bf16.msra.mxu3 %v886_v10  ;;  %v727_v47 = vld [vmem:[#allocation2 + $0x68] sm:$0xf0]  ;;  %v993_v48 = vld [vmem:[#allocation2 + $0xe4] sm:$0xf]  ;;  %v866_v49 = vor.u32 %v1011_v38, %v863_v39  ;;  %v941_v63 = vld [vmem:[#allocation2 + $0x210] sm:$0xf] }
  0x20   :  { %494 = vmatpush.bf16.msra.mxu0 %v686_v17  ;;  %v791_v50 = vld [vmem:[#allocation2 + $0xe8] sm:$0xf0]  ;;  %v1009_v51 = vld [vmem:[#allocation2 + $0x164] sm:$0xf]  ;;  %v730_v57 = vor.u32 %v977_v46, %v727_v47  ;;  %v1032_v0 = vld [vmem:[#allocation2 + $0x214] sm:$0xf0] }
  0x21   :  { %507 = vmatpush.bf16.msra.mxu1 %v750_v21  ;;  %v855_v52 = vld [vmem:[#allocation2 + $0x168] sm:$0xf0]  ;;  %v37_v53 = vld.sshfl [vmem:[#allocation1] sm:$0xff pattern:$0x73625140]  ;;  %v794_v61 = vor.u32 %v993_v48, %v791_v50  ;;  %v942_v9 = vor.u32 %v1032_v0, %v941_v63  ;;  %vm621_vm1 = vcmask 1041408  }
  0x22   :  { %520 = vmatpush.bf16.msra.mxu2 %v814_v22  ;;  %v38_v55 = vld.sshfl [vmem:[#allocation1 + $0x8] sm:$0xff pattern:$0x73625140]  ;;  %v1095_v56 = vpack.c.bf16 %v37_v53, %v37_v53  ;;  %v39_v59 = vld.sshfl [vmem:[#allocation1 + $0x10] sm:$0xff pattern:$0x73625140]  ;;  %v858_v3 = vor.u32 %v1009_v51, %v855_v52 }
  0x23   :  { %533 = vmatpush.bf16.msra.mxu3 %v878_v26  ;;  %v1097_v58 = vpack.c.bf16 %v38_v55, %v38_v55  ;;  %v40_v60 = vld.sshfl [vmem:[#allocation1 + $0x18] sm:$0xff pattern:$0x73625140]  ;;  %v1099_v62 = vpack.c.bf16 %v39_v59, %v39_v59  ;;  %v719_v4 = vld [vmem:[#allocation2 + $0x58] sm:$0xf0] }
  0x24   :  { %495 = vmatpush.bf16.msra.mxu0 %v678_v32  ;;  %v975_v1 = vld [vmem:[#allocation2 + $0x54] sm:$0xf]  ;;  %v1101_v2 = vpack.c.bf16 %v40_v60, %v40_v60  ;;  %v783_v6 = vld [vmem:[#allocation2 + $0xd8] sm:$0xf0]  ;;  %v933_v10 = vld [vmem:[#allocation2 + $0x200] sm:$0xf] }
  0x25   :  { %508 = vmatpush.bf16.msra.mxu1 %v742_v36  ;;  %v991_v5 = vld [vmem:[#allocation2 + $0xd4] sm:$0xf]  ;;  %v847_v8 = vld [vmem:[#allocation2 + $0x158] sm:$0xf0]  ;;  %v1030_v11 = vld [vmem:[#allocation2 + $0x204] sm:$0xf0]  ;;  %v722_v13 = vor.u32 %v975_v1, %v719_v4 }
  0x26   :  { %521 = vmatpush.bf16.msra.mxu2 %v806_v37  ;;  %v1007_v7 = vld [vmem:[#allocation2 + $0x154] sm:$0xf]  ;;  %v973_v12 = vld [vmem:[#allocation2 + $0x44] sm:$0xf]  ;;  %v786_v14 = vor.u32 %v991_v5, %v783_v6  ;;  %v711_v15 = vld [vmem:[#allocation2 + $0x48] sm:$0xf0]  ;;  %v934_v24 = vor.u32 %v1030_v11, %v933_v10 }
  0x27   :  { %534 = vmatpush.bf16.msra.mxu3 %v870_v40  ;;  %496 = vmatmul.bf16.vlgmr.msra.gmra.mxu0 %v1095_v56  ;;  %v989_v16 = vld [vmem:[#allocation2 + $0xc4] sm:$0xf]  ;;  %v31_v17 = vld [vmem:[%s1132_s0 + $0x8] sm:$0x3]  ;;  %v850_v18 = vor.u32 %v1007_v7, %v847_v8  ;;  %v775_v19 = vld [vmem:[#allocation2 + $0xc8] sm:$0xf0]  ;;  %v714_v25 = vor.u32 %v973_v12, %v711_v15 }
  0x28   :  { %544 = vmatpush.bf16.msrb.mxu0 %v958_v41  ;;  %509 = vmatmul.bf16.vlgmr.msra.gmra.mxu1 %v1097_v58  ;;  %v1005_v20 = vld [vmem:[#allocation2 + $0x144] sm:$0xf]  ;;  %36 = vst [vmem:[#allocation1 + $0x20] ss:$4 sm:$0xff] %v31_v17  ;;  %v839_v21 = vld [vmem:[#allocation2 + $0x148] sm:$0xf0]  ;;  %v778_v26 = vor.u32 %v989_v16, %v775_v19 }
  0x29   :  { %553 = vmatpush.bf16.msrb.mxu1 %v738_v44  ;;  %522 = vmatmul.bf16.vlgmr.msra.gmra.mxu2 %v1099_v62  ;;  %v1027_v22 = vld [vmem:[#allocation2 + $0x1f4] sm:$0xf]  ;;  %v927_v23 = vld [vmem:[#allocation2 + $0x1f8] sm:$0xf0]  ;;  %v842_v29 = vor.u32 %v1005_v20, %v839_v21  ;;  %v1025_v35 = vld [vmem:[#allocation2 + $0x1e4] sm:$0xf] }
  0x2a   :  { %566 = vmatpush.bf16.msrb.mxu2 %v802_v45  ;;  %535 = vmatmul.bf16.vlgmr.msra.gmra.mxu3 %v1101_v2  ;;  %v971_v27 = vld [vmem:[#allocation2 + $0x34] sm:$0xf]  ;;  %v703_v28 = vld [vmem:[#allocation2 + $0x38] sm:$0xf0]  ;;  %v930_v30 = vor.u32 %v1027_v22, %v927_v23  ;;  %v919_v36 = vld [vmem:[#allocation2 + $0x1e8] sm:$0xf0] }
  0x2b   :  { %579 = vmatpush.bf16.msrb.mxu3 %v866_v49  ;;  %v987_v31 = vld [vmem:[#allocation2 + $0xb4] sm:$0xf]  ;;  %v767_v32 = vld [vmem:[#allocation2 + $0xb8] sm:$0xf0]  ;;  %v969_v37 = vld [vmem:[#allocation2 + $0x24] sm:$0xf]  ;;  %v706_v38 = vor.u32 %v971_v27, %v703_v28  ;;  %v922_v43 = vor.u32 %v1025_v35, %v919_v36 }
  0x2c   :  { %545 = vmatpush.bf16.msrb.mxu0 %v950_v54  ;;  %v1003_v33 = vld [vmem:[#allocation2 + $0x134] sm:$0xf]  ;;  %v831_v34 = vld [vmem:[#allocation2 + $0x138] sm:$0xf0]  ;;  %v770_v39 = vor.u32 %v987_v31, %v767_v32  ;;  %v695_v41 = vld [vmem:[#allocation2 + $0x28] sm:$0xf0] }
  0x2d   :  { %554 = vmatpush.bf16.msrb.mxu1 %v730_v57  ;;  %v834_v42 = vor.u32 %v1003_v33, %v831_v34  ;;  %v985_v44 = vld [vmem:[#allocation2 + $0xa4] sm:$0xf]  ;;  %v759_v45 = vld [vmem:[#allocation2 + $0xa8] sm:$0xf0]  ;;  %v1023_v49 = vld [vmem:[#allocation2 + $0x1d4] sm:$0xf]  ;;  %v698_v51 = vor.u32 %v969_v37, %v695_v41 }
  0x2e   :  { %567 = vmatpush.bf16.msrb.mxu2 %v794_v61  ;;  %v1001_v46 = vld [vmem:[#allocation2 + $0x124] sm:$0xf]  ;;  %v823_v48 = vld [vmem:[#allocation2 + $0x128] sm:$0xf0]  ;;  %v911_v50 = vld [vmem:[#allocation2 + $0x1d8] sm:$0xf0]  ;;  %v762_v52 = vor.u32 %v985_v44, %v759_v45 }
  0x2f   :  { %580 = vmatpush.bf16.msrb.mxu3 %v858_v3  ;;  %v41_v40 = vld.sshfl [vmem:[#allocation1 + $0x20] sm:$0xff pattern:$0x73625140]  ;;  %v967_v53 = vld [vmem:[#allocation2 + $0x14] sm:$0xf]  ;;  %v826_v55 = vor.u32 %v1001_v46, %v823_v48  ;;  %v914_v57 = vor.u32 %v1023_v49, %v911_v50 }
  0x30   :  { %546 = vmatpush.bf16.msrb.mxu0 %v942_v9  ;;  %v1110_v47 = vpack.c.bf16 %v41_v40, %v41_v40  ;;  %v687_v54 = vld [vmem:[#allocation2 + $0x18] sm:$0xf0]  ;;  %v983_v59 = vld [vmem:[#allocation2 + $0x94] sm:$0xf]  ;;  %v1021_v0 = vld [vmem:[#allocation2 + $0x1c4] sm:$0xf] }
  0x31   :  { %555 = vmatpush.bf16.msrb.mxu1 %v722_v13  ;;  %v751_v60 = vld [vmem:[#allocation2 + $0x98] sm:$0xf0]  ;;  %v999_v61 = vld [vmem:[#allocation2 + $0x114] sm:$0xf]  ;;  %v903_v1 = vld [vmem:[#allocation2 + $0x1c8] sm:$0xf0]  ;;  %v690_v3 = vor.u32 %v967_v53, %v687_v54 }
  0x32   :  { %568 = vmatpush.bf16.msrb.mxu2 %v786_v14  ;;  %v815_v63 = vld [vmem:[#allocation2 + $0x118] sm:$0xf0]  ;;  %v754_v4 = vor.u32 %v983_v59, %v751_v60  ;;  %v965_v5 = vld [vmem:[#allocation2 + $0x4] sm:$0xf]  ;;  %v679_v6 = vld [vmem:[#allocation2 + $0x8] sm:$0xf0]  ;;  %v906_v8 = vor.u32 %v1021_v0, %v903_v1 }
  0x33   :  { %581 = vmatpush.bf16.msrb.mxu3 %v850_v18  ;;  %v818_v7 = vor.u32 %v999_v61, %v815_v63  ;;  %v981_v9 = vld [vmem:[#allocation2 + $0x84] sm:$0xf]  ;;  %v743_v10 = vld [vmem:[#allocation2 + $0x88] sm:$0xf0]  ;;  %v1019_v13 = vld [vmem:[#allocation2 + $0x1b4] sm:$0xf]  ;;  %v682_v17 = vor.u32 %v965_v5, %v679_v6 }
  0x34   :  { %547 = vmatpush.bf16.msrb.mxu0 %v934_v24  ;;  %v997_v11 = vld [vmem:[#allocation2 + $0x104] sm:$0xf]  ;;  %v807_v12 = vld [vmem:[#allocation2 + $0x108] sm:$0xf0]  ;;  %v895_v14 = vld [vmem:[#allocation2 + $0x1b8] sm:$0xf0]  ;;  %v746_v18 = vor.u32 %v981_v9, %v743_v10 }
  0x35   :  { %556 = vmatpush.bf16.msrb.mxu1 %v714_v25  ;;  %v1035_v15 = vld [vmem:[#allocation2 + $0x234] sm:$0xf]  ;;  %v959_v16 = vld [vmem:[#allocation2 + $0x238] sm:$0xf0]  ;;  %v810_v19 = vor.u32 %v997_v11, %v807_v12  ;;  %v898_v20 = vor.u32 %v1019_v13, %v895_v14  ;;  %v1017_v22 = vld [vmem:[#allocation2 + $0x1a4] sm:$0xf] }
  0x36   :  { %569 = vmatpush.bf16.msrb.mxu2 %v778_v26  ;;  %v962_v21 = vor.u32 %v1035_v15, %v959_v16  ;;  %v887_v23 = vld [vmem:[#allocation2 + $0x1a8] sm:$0xf0]  ;;  %v1033_v24 = vld [vmem:[#allocation2 + $0x224] sm:$0xf]  ;;  %v1015_v28 = vld [vmem:[#allocation2 + $0x194] sm:$0xf] }
  0x37   :  { %582 = vmatpush.bf16.msrb.mxu3 %v842_v29  ;;  %963 = vmatmul.msk.bf16.vlgmr.msrb.gmra.mxu0 %vm484_vm0, %v1110_v47  ;;  %v951_v25 = vld [vmem:[#allocation2 + $0x228] sm:$0xf0]  ;;  %v890_v26 = vor.u32 %v1017_v22, %v887_v23  ;;  %v879_v29 = vld [vmem:[#allocation2 + $0x198] sm:$0xf0]  ;;  %v1013_v34 = vld [vmem:[#allocation2 + $0x184] sm:$0xf] }
  0x38   :  { %592 = vmatpush.bf16.msra.mxu0 %v930_v30  ;;  %v954_v27 = vor.u32 %v1033_v24, %v951_v25  ;;  %v1031_v30 = vld [vmem:[#allocation2 + $0x214] sm:$0xf]  ;;  %v943_v31 = vld [vmem:[#allocation2 + $0x218] sm:$0xf0]  ;;  %v882_v32 = vor.u32 %v1015_v28, %v879_v29  ;;  %v871_v35 = vld [vmem:[#allocation2 + $0x188] sm:$0xf0]  ;;  %v655_v24 = vlaneseq }
  0x39   :  { %557 = vmatpush.bf16.msrb.mxu1 %v706_v38  ;;  %v946_v33 = vor.u32 %v1031_v30, %v943_v31  ;;  %v1029_v36 = vld [vmem:[#allocation2 + $0x204] sm:$0xf]  ;;  %v935_v37 = vld [vmem:[#allocation2 + $0x208] sm:$0xf0]  ;;  %v874_v38 = vor.u32 %v1013_v34, %v871_v35 }
  0x3a   :  { %570 = vmatpush.bf16.msrb.mxu2 %v770_v39  ;;  %v938_v39 = vor.u32 %v1029_v36, %v935_v37  ;;  %v656_v31 = vshrl.u32 %v655_v24, 7 }
  0x3b   :  { %583 = vmatpush.bf16.msrb.mxu3 %v834_v42 }
  0x3c   :  { %593 = vmatpush.bf16.msra.mxu0 %v922_v43  ;;  %vm657_vm2 = vcmp.eq.s32.totalorder %v656_v31, 0 }
  0x3d   :  { %558 = vmatpush.bf16.msrb.mxu1 %v698_v51 }
  0x3e   :  { %571 = vmatpush.bf16.msrb.mxu2 %v762_v52 }
  0x3f   :  { %584 = vmatpush.bf16.msrb.mxu3 %v826_v55 }
  0x40   :  { %594 = vmatpush.bf16.msra.mxu0 %v914_v57 }
  0x41   :  { %559 = vmatpush.bf16.msrb.mxu1 %v690_v3 }
  0x42   :  { %572 = vmatpush.bf16.msrb.mxu2 %v754_v4 }
  0x43   :  { %585 = vmatpush.bf16.msrb.mxu3 %v818_v7 }
  0x44   :  { %595 = vmatpush.bf16.msra.mxu0 %v906_v8 }
  0x45   :  { %560 = vmatpush.bf16.msrb.mxu1 %v682_v17 }
  0x46   :  { %573 = vmatpush.bf16.msrb.mxu2 %v746_v18 }
  0x47   :  { %586 = vmatpush.bf16.msrb.mxu3 %v810_v19 }
  0x48   :  { %596 = vmatpush.bf16.msra.mxu0 %v898_v20  ;;  %561 = vmatmul.bf16.vlgmr.msrb.gmra.mxu1 %v1095_v56 }
  0x49   :  { %609 = vmatpush.bf16.msra.mxu1 %v962_v21  ;;  %574 = vmatmul.bf16.vlgmr.msrb.gmra.mxu2 %v1097_v58 }
  0x4a   :  { %587 = vmatmul.bf16.vlgmr.msrb.gmra.mxu3 %v1099_v62 }
  0x4c   :  { %597 = vmatpush.bf16.msra.mxu0 %v890_v26 }
  0x4d   :  { %610 = vmatpush.bf16.msra.mxu1 %v954_v27 }
  0x50   :  { %598 = vmatpush.bf16.msra.mxu0 %v882_v32 }
  0x51   :  { %611 = vmatpush.bf16.msra.mxu1 %v946_v33 }
  0x54   :  { %599 = vmatpush.bf16.msra.mxu0 %v874_v38 }
  0x55   :  { %612 = vmatpush.bf16.msra.mxu1 %v938_v39 }
  0x57   :  { %600 = vmatmul.bf16.vlgmr.msra.gmra.mxu0 %v1101_v2 }
  0x58   :  { %964 = vmatmul.msk.bf16.vlgmr.msra.gmra.mxu1 %vm484_vm0, %v1110_v47 }
  0xa4   :  { %v497_v56 = vpop.f32.mrf.mxu0 }
  0xa5   :  { %v510_v58 = vpop.f32.mrf.mxu1 }
  0xa6   :  { %v511_v46 = vadd.f32 %v510_v58, %v497_v56 }
  0xac   :  { %v523_v62 = vpop.f32.mrf.mxu2  ;;  %v499_v40 = vpop.f32.mrf.mxu0 }
  0xad   :  { %v536_v41 = vpop.f32.mrf.mxu3  ;;  %v512_v42 = vpop.f32.mrf.mxu1  ;;  %v524_v48 = vadd.f32 %v523_v62, %v511_v46 }
  0xaf   :  { %v537_v50 = vadd.f32 %v536_v41, %v524_v48 }
  0xb4   :  { %v525_v43 = vpop.f32.mrf.mxu2  ;;  %v549_v45 = vpop.f32.mrf.mxu0 }
  0xb5   :  { %v538_v44 = vpop.f32.mrf.mxu3  ;;  %v550_v52 = vadd.f32 %v549_v45, %v537_v50 }
  0xb7   :  { %v639_v53 = vmul.f32 %v550_v52, %v550_v52  ;;  %v625_v59 = vsel %vm621_vm1, %v550_v52, 0.0 }
  0xb8   :  { %v626_v0 = vrot.slane %v625_v59, 4 }
  0xb9   :  { %v641_v57 = vsel %vm621_vm1, %v639_v53, 0.0 }
  0xba   :  { %v642_v60 = vrot.slane %v641_v57, 4  ;;  %v627_v8 = vadd.f32 %v626_v0, %v625_v59 }
  0xbc   :  { %v551_v49 = vpop.f32.mrf.mxu0  ;;  %v643_v5 = vadd.f32 %v642_v60, %v641_v57  ;;  %v628_v17 = vrot.slane %v627_v8, 2 }
  0xbe   :  { %v644_v12 = vrot.slane %v643_v5, 2  ;;  %v629_v25 = vadd.f32 %v628_v17, %v627_v8 }
  0xc0   :  { %v645_v20 = vadd.f32 %v644_v12, %v643_v5  ;;  %v630_v32 = vrot.slane %v629_v25, 1 }
  0xc2   :  { %v646_v28 = vrot.slane %v645_v20, 1  ;;  %v631_v37 = vadd.f32 %v630_v32, %v629_v25 }
  0xc4   :  { %v647_v34 = vadd.f32 %v646_v28, %v645_v20 }
  0xc5   :  { %v562_v51 = vpop.f32.mrf.mxu1 }
  0xc6   :  { %v658_v56 = vsel %vm657_vm2, %v631_v37, %v647_v34 }
  0xcc   :  { %v575_v2 = vpop.f32.mrf.mxu2 }
  0xcd   :  { %v588_v54 = vpop.f32.mrf.mxu3  ;;  %v576_v47 = vadd.f32 %v575_v2, %v562_v51  ;;  %v564_v55 = vpop.f32.mrf.mxu1 }
  0xcf   :  { %v589_v61 = vadd.f32 %v588_v54, %v576_v47 }
  0xd4   :  { %v601_v63 = vpop.f32.mrf.mxu0  ;;  %v577_v3 = vpop.f32.mrf.mxu2 }
  0xd5   :  { %v602_v1 = vadd.f32 %v601_v63, %v589_v61  ;;  %v590_v4 = vpop.f32.mrf.mxu3  ;;  %v614_v6 = vpop.f32.mrf.mxu1 }
  0xd7   :  { %v615_v7 = vadd.f32 %v614_v6, %v602_v1 }
  0xd9   :  { %v620_v9 = vrot.slane %v615_v7, 6  ;;  %v632_v10 = vsel %vm621_vm1, %v615_v7, 0.0  ;;  %v640_v11 = vmul.f32 %v615_v7, %v615_v7 }
  0xda   :  { %v633_v13 = vrot.slane %v632_v10, 4 }
  0xdb   :  { %v622_v14 = vsel %vm621_vm1, %v550_v52, %v620_v9  ;;  %v648_v15 = vsel %vm621_vm1, %v640_v11, 0.0 }
  0xdc   :  { %v603_v16 = vpop.f32.mrf.mxu0  ;;  %624 = vst [vmem:[%s1134_s2] sm:$0xf] %v622_v14  ;;  %v634_v18 = vadd.f32 %v633_v13, %v632_v10  ;;  %v649_v19 = vrot.slane %v648_v15, 4 }
  0xdd   :  { %v616_v23 = vpop.f32.mrf.mxu1 }
  0xde   :  { %v635_v21 = vrot.slane %v634_v18, 2  ;;  %v650_v22 = vadd.f32 %v649_v19, %v648_v15 }
  0xe0   :  { %v636_v26 = vadd.f32 %v635_v21, %v634_v18  ;;  %v651_v27 = vrot.slane %v650_v22, 2 }
  0xe2   :  { %v637_v29 = vrot.slane %v636_v26, 1  ;;  %v652_v30 = vadd.f32 %v651_v27, %v650_v22 }
  0xe4   :  { %v653_v33 = vrot.slane %v652_v30, 1  ;;  %v638_v35 = vadd.f32 %v637_v29, %v636_v26 }
  0xe6   :  { %v654_v36 = vadd.f32 %v653_v33, %v652_v30 }
  0xe8   :  { %v659_v38 = vsel %vm657_vm2, %v638_v35, %v654_v36 }
  0xe9   :  { %v662_v39 = vrot.slane %v659_v38, 6 }
  0xeb   :  { %v663_v58 = vsel %vm621_vm1, %v658_v56, %v662_v39 }
  0xec   :  { %665 = vst [vmem:[%s1135_s3] sm:$0xf] %v663_v58 }
  0xed   :  { %674 = vsyncpa [#allocation3], 1 }

// kernel: tile.50
= control target key start
LH: loop header
LB: loop body
LE: loop exit
PB: predicated region body
PF: predicated region fallthrough
CT: control target
= control target key end

     0   :  { %s22_s0 = inlined_call_operand.vmem [shape: f32[32], index: 0, kind: input, shape index: {}]   ;;  %s23_s1 = inlined_call_operand.vmem [shape: f32[4,32], index: 1, kind: output, shape index: {}]  }
   0x1   :  { %v4_v0 = vld [vmem:[%s22_s0] ss:$0 sm:$0xff] }
   0x2   :  { %5 = vst [vmem:[%s23_s1] sm:$0xf] %v4_v0 }

// kernel: conditional_decoder_forward.8
= control target key start
LH: loop header
LB: loop body
LE: loop exit
PB: predicated region body
PF: predicated region fallthrough
CT: control target
= control target key end

     0   :  { %vm357_vm0 = vcmask 523264   ;;  %s813_s1 = inlined_call_operand.vmem [shape: bf16[576,128], index: 1, kind: input, shape index: {}]   ;;  %s814_s2 = inlined_call_operand.vmem [shape: f32[1,576], index: 2, kind: input, shape index: {}]   ;;  %s815_s0 = inlined_call_operand.vmem [shape: f32[8,576], index: 0, kind: input, shape index: {}]   ;;  %s816_s3 = inlined_call_operand.vmem [shape: f32[1,576], index: 3, kind: input, shape index: {}]   ;;  %s817_s4 = inlined_call_operand.vmem [shape: f32[8,128], index: 4, kind: output, shape index: {0}]   ;;  %s818_s5 = inlined_call_operand.vmem [shape: f32[1,2,128], index: 5, kind: output, shape index: {1}]  }
   0x1   :  { %v605_v0 = vld [vmem:[%s813_s1 + $0x38] sm:$0xff]  ;;  %v604_v4 = vld [vmem:[%s813_s1 + $0x30] sm:$0xff]  ;;  %v603_v8 = vld [vmem:[%s813_s1 + $0x28] sm:$0xff] }
   0x2   :  { %v613_v1 = vld [vmem:[%s813_s1 + $0x78] sm:$0xff]  ;;  %361 = vmatpush.bf16.msra.mxu0 %v605_v0  ;;  %v612_v5 = vld [vmem:[%s813_s1 + $0x70] sm:$0xff]  ;;  %v611_v9 = vld [vmem:[%s813_s1 + $0x68] sm:$0xff] }
   0x3   :  { %v621_v2 = vld [vmem:[%s813_s1 + $0xb8] sm:$0xff]  ;;  %374 = vmatpush.bf16.msra.mxu1 %v613_v1  ;;  %v620_v6 = vld [vmem:[%s813_s1 + $0xb0] sm:$0xff]  ;;  %v619_v10 = vld [vmem:[%s813_s1 + $0xa8] sm:$0xff] }
   0x4   :  { %v629_v3 = vld [vmem:[%s813_s1 + $0xf8] sm:$0xff]  ;;  %387 = vmatpush.bf16.msra.mxu2 %v621_v2  ;;  %v628_v7 = vld [vmem:[%s813_s1 + $0xf0] sm:$0xff]  ;;  %v627_v11 = vld [vmem:[%s813_s1 + $0xe8] sm:$0xff] }
   0x5   :  { %400 = vmatpush.bf16.msra.mxu3 %v629_v3  ;;  %v602_v12 = vld [vmem:[%s813_s1 + $0x20] sm:$0xff]  ;;  %v601_v17 = vld [vmem:[%s813_s1 + $0x18] sm:$0xff]  ;;  %v21_v24 = vld [vmem:[%s815_s0 + $0x8] sm:$0xff] }
   0x6   :  { %362 = vmatpush.bf16.msra.mxu0 %v604_v4  ;;  %v610_v13 = vld [vmem:[%s813_s1 + $0x60] sm:$0xff]  ;;  %v609_v18 = vld [vmem:[%s813_s1 + $0x58] sm:$0xff]  ;;  %v22_v28 = vld [vmem:[%s815_s0 + $0x10] sm:$0xff] }
   0x7   :  { %375 = vmatpush.bf16.msra.mxu1 %v612_v5  ;;  %v618_v14 = vld [vmem:[%s813_s1 + $0xa0] sm:$0xff]  ;;  %v617_v19 = vld [vmem:[%s813_s1 + $0x98] sm:$0xff]  ;;  %v600_v34 = vld [vmem:[%s813_s1 + $0x10] sm:$0xff] }
   0x8   :  { %388 = vmatpush.bf16.msra.mxu2 %v620_v6  ;;  %v626_v15 = vld [vmem:[%s813_s1 + $0xe0] sm:$0xff]  ;;  %v625_v27 = vld [vmem:[%s813_s1 + $0xd8] sm:$0xff]  ;;  %v608_v35 = vld [vmem:[%s813_s1 + $0x50] sm:$0xff] }
   0x9   :  { %401 = vmatpush.bf16.msra.mxu3 %v628_v7  ;;  %v715_v16 = vld [vmem:[%s814_s2] sm:$0x1f]  ;;  %v23_v29 = vld [vmem:[%s815_s0 + $0x18] sm:$0xff]  ;;  %v616_v40 = vld [vmem:[%s813_s1 + $0x90] sm:$0xff] }
   0xa   :  { %363 = vmatpush.bf16.msra.mxu0 %v603_v8  ;;  %v27_v20 = vperm.slane %v715_v16, 0  ;;  %v28_v21 = vperm.slane %v715_v16, 1  ;;  %v20_v22 = vld [vmem:[%s815_s0] sm:$0xff]  ;;  %v29_v25 = vperm.slane %v715_v16, 2  ;;  %v30_v26 = vperm.slane %v715_v16, 3  ;;  %v624_v41 = vld [vmem:[%s813_s1 + $0xd0] sm:$0xff] }
   0xb   :  { %376 = vmatpush.bf16.msra.mxu1 %v611_v9  ;;  %v734_v23 = vld [vmem:[%s816_s3] sm:$0x1f]  ;;  %v599_v44 = vld [vmem:[%s813_s1 + $0x8] sm:$0xff]  ;;  %v633_v58 = vld [vmem:[%s813_s1 + $0x118] sm:$0xff]  ;;  %v31_v61 = vperm.slane %v715_v16, 4 }
   0xc   :  { %389 = vmatpush.bf16.msra.mxu2 %v619_v10  ;;  %v37_v30 = vmul.f32 %v27_v20, %v20_v22  ;;  %v44_v31 = vperm.slane %v734_v23, 0  ;;  %v38_v32 = vmul.f32 %v28_v21, %v21_v24  ;;  %v45_v33 = vperm.slane %v734_v23, 1  ;;  %v607_v45 = vld [vmem:[%s813_s1 + $0x48] sm:$0xff]  ;;  %v598_v52 = vld [vmem:[%s813_s1] sm:$0xff]  ;;  %v632_v1 = vld [vmem:[%s813_s1 + $0x110] sm:$0xff] }
   0xd   :  { %402 = vmatpush.bf16.msra.mxu3 %v627_v11  ;;  %v39_v36 = vmul.f32 %v29_v25, %v22_v28  ;;  %v46_v37 = vperm.slane %v734_v23, 2  ;;  %v40_v38 = vmul.f32 %v30_v26, %v23_v29  ;;  %v47_v39 = vperm.slane %v734_v23, 3  ;;  %v615_v48 = vld [vmem:[%s813_s1 + $0x88] sm:$0xff]  ;;  %v606_v53 = vld [vmem:[%s813_s1 + $0x40] sm:$0xff] }
   0xe   :  { %364 = vmatpush.bf16.msra.mxu0 %v602_v12  ;;  %v54_v42 = vadd.f32 %v44_v31, %v37_v30  ;;  %v55_v43 = vadd.f32 %v45_v33, %v38_v32  ;;  %v623_v49 = vld [vmem:[%s813_s1 + $0xc8] sm:$0xff]  ;;  %v614_v56 = vld [vmem:[%s813_s1 + $0x80] sm:$0xff]  ;;  %v48_v3 = vperm.slane %v734_v23, 4  ;;  %v440_v26 = vlaneseq }
   0xf   :  { %377 = vmatpush.bf16.msra.mxu1 %v610_v13  ;;  %v56_v46 = vadd.f32 %v46_v37, %v39_v36  ;;  %v57_v47 = vadd.f32 %v47_v39, %v40_v38  ;;  %v622_v57 = vld [vmem:[%s813_s1 + $0xc0] sm:$0xff]  ;;  %v631_v4 = vld [vmem:[%s813_s1 + $0x108] sm:$0xff] }
  0x10   :  { %390 = vmatpush.bf16.msra.mxu2 %v618_v14  ;;  %v59_v50 = vmax.f32 %v54_v42, 0.0  ;;  %v60_v51 = vmax.f32 %v55_v43, 0.0  ;;  %v24_v0 = vld [vmem:[%s815_s0 + $0x20] sm:$0xff]  ;;  %v441_v32 = vshrl.u32 %v440_v26, 7 }
  0x11   :  { %403 = vmatpush.bf16.msra.mxu3 %v626_v15  ;;  %v61_v54 = vmax.f32 %v56_v46, 0.0  ;;  %v62_v55 = vmax.f32 %v57_v47, 0.0  ;;  %v41_v2 = vmul.f32 %v31_v61, %v24_v0  ;;  %v630_v6 = vld [vmem:[%s813_s1 + $0x100] sm:$0xff] }
  0x12   :  { %365 = vmatpush.bf16.msra.mxu0 %v601_v17  ;;  %v64_v59 = vpack.c.bf16 %v59_v50, %v59_v50  ;;  %v65_v60 = vpack.c.bf16 %v60_v51, %v60_v51  ;;  %vm442_vm1 = vcmp.eq.s32.totalorder %v441_v32, 0 }
  0x13   :  { %378 = vmatpush.bf16.msra.mxu1 %v609_v18  ;;  %v66_v62 = vpack.c.bf16 %v61_v54, %v61_v54  ;;  %v67_v63 = vpack.c.bf16 %v62_v55, %v62_v55  ;;  %v58_v5 = vadd.f32 %v48_v3, %v41_v2 }
  0x14   :  { %391 = vmatpush.bf16.msra.mxu2 %v617_v19 }
  0x15   :  { %404 = vmatpush.bf16.msra.mxu3 %v625_v27  ;;  %v63_v7 = vmax.f32 %v58_v5, 0.0 }
  0x16   :  { %366 = vmatpush.bf16.msra.mxu0 %v600_v34 }
  0x17   :  { %379 = vmatpush.bf16.msra.mxu1 %v608_v35  ;;  %v68_v8 = vpack.c.bf16 %v63_v7, %v63_v7 }
  0x18   :  { %392 = vmatpush.bf16.msra.mxu2 %v616_v40 }
  0x19   :  { %405 = vmatpush.bf16.msra.mxu3 %v624_v41 }
  0x1a   :  { %367 = vmatpush.bf16.msra.mxu0 %v599_v44 }
  0x1b   :  { %380 = vmatpush.bf16.msra.mxu1 %v607_v45 }
  0x1c   :  { %393 = vmatpush.bf16.msra.mxu2 %v615_v48 }
  0x1d   :  { %406 = vmatpush.bf16.msra.mxu3 %v623_v49 }
  0x1e   :  { %368 = vmatpush.bf16.msra.mxu0 %v598_v52 }
  0x1f   :  { %381 = vmatpush.bf16.msra.mxu1 %v606_v53 }
  0x20   :  { %394 = vmatpush.bf16.msra.mxu2 %v614_v56 }
  0x21   :  { %407 = vmatpush.bf16.msra.mxu3 %v622_v57  ;;  %369 = vmatmul.bf16.vlgmr.msra.gmra.mxu0 %v64_v59 }
  0x22   :  { %417 = vmatpush.bf16.msrb.mxu0 %v633_v58  ;;  %382 = vmatmul.bf16.vlgmr.msra.gmra.mxu1 %v65_v60 }
  0x23   :  { %395 = vmatmul.bf16.vlgmr.msra.gmra.mxu2 %v66_v62 }
  0x24   :  { %408 = vmatmul.bf16.vlgmr.msra.gmra.mxu3 %v67_v63 }
  0x26   :  { %418 = vmatpush.bf16.msrb.mxu0 %v632_v1 }
  0x2a   :  { %419 = vmatpush.bf16.msrb.mxu0 %v631_v4 }
  0x2e   :  { %420 = vmatpush.bf16.msrb.mxu0 %v630_v6 }
  0x31   :  { %597 = vmatmul.msk.bf16.vlgmr.msrb.gmra.mxu0 %vm357_vm0, %v68_v8 }
  0x9e   :  { %v370_v9 = vpop.f32.mrf.mxu0 }
  0x9f   :  { %v383_v10 = vpop.f32.mrf.mxu1 }
  0xa0   :  { %v384_v15 = vadd.f32 %v383_v10, %v370_v9 }
  0xa6   :  { %v396_v11 = vpop.f32.mrf.mxu2  ;;  %v372_v13 = vpop.f32.mrf.mxu0 }
  0xa7   :  { %v409_v12 = vpop.f32.mrf.mxu3  ;;  %v385_v14 = vpop.f32.mrf.mxu1  ;;  %v397_v16 = vadd.f32 %v396_v11, %v384_v15 }
  0xa9   :  { %v410_v17 = vadd.f32 %v409_v12, %v397_v16 }
  0xae   :  { %v398_v18 = vpop.f32.mrf.mxu2  ;;  %v422_v20 = vpop.f32.mrf.mxu0 }
  0xaf   :  { %v411_v19 = vpop.f32.mrf.mxu3  ;;  %v423_v21 = vadd.f32 %v422_v20, %v410_v17 }
  0xb1   :  { %426 = vst [vmem:[%s817_s4] sm:$0xff] %v423_v21  ;;  %v427_v22 = vrot.slane %v423_v21, 4  ;;  %v433_v23 = vmul.f32 %v423_v21, %v423_v21 }
  0xb3   :  { %v428_v24 = vadd.f32 %v427_v22, %v423_v21  ;;  %v434_v25 = vrot.slane %v433_v23, 4 }
  0xb5   :  { %v429_v27 = vrot.slane %v428_v24, 2  ;;  %v435_v28 = vadd.f32 %v434_v25, %v433_v23 }
  0xb6   :  { %v424_v29 = vpop.f32.mrf.mxu0 }
  0xb7   :  { %v430_v30 = vadd.f32 %v429_v27, %v428_v24  ;;  %v436_v31 = vrot.slane %v435_v28, 2 }
  0xb9   :  { %v431_v33 = vrot.slane %v430_v30, 1  ;;  %v437_v34 = vadd.f32 %v436_v31, %v435_v28 }
  0xbb   :  { %v438_v35 = vrot.slane %v437_v34, 1  ;;  %v432_v36 = vadd.f32 %v431_v33, %v430_v30 }
  0xbd   :  { %v439_v37 = vadd.f32 %v438_v35, %v437_v34 }
  0xbf   :  { %v443_v38 = vsel %vm442_vm1, %v432_v36, %v439_v37 }
  0xc0   :  { %444 = vst [vmem:[%s818_s5] sm:$0x3] %v443_v38 }

// kernel: conditional_decoder_forward.9
= control target key start
LH: loop header
LB: loop body
LE: loop exit
PB: predicated region body
PF: predicated region fallthrough
CT: control target
= control target key end

     0   :  { %vm234_vm0 = vcmask 261120   ;;  %s586_s1 = inlined_call_operand.vmem [shape: bf16[288,128], index: 1, kind: input, shape index: {}]   ;;  %s587_s0 = inlined_call_operand.vmem [shape: f32[32,288], index: 0, kind: input, shape index: {}]   ;;  %s588_s2 = inlined_call_operand.vmem [shape: f32[1,288], index: 2, kind: input, shape index: {}]   ;;  %s589_s3 = inlined_call_operand.vmem [shape: f32[1,288], index: 3, kind: input, shape index: {}]   ;;  %s590_s4 = inlined_call_operand.vmem [shape: f32[32,128], index: 4, kind: output, shape index: {0}]   ;;  %s591_s5 = inlined_call_operand.vmem [shape: f32[1,2,128], index: 5, kind: output, shape index: {1}]  }
   0x1   :  { %v418_v0 = vld [vmem:[%s586_s1 + $0x38] sm:$0xff]  ;;  %v417_v2 = vld [vmem:[%s586_s1 + $0x30] sm:$0xff]  ;;  %v428_v4 = vld [vmem:[%s586_s1 + $0x88] sm:$0xff] }
   0x2   :  { %v426_v1 = vld [vmem:[%s586_s1 + $0x78] sm:$0xff]  ;;  %241 = vmatpush.bf16.msra.mxu0 %v418_v0  ;;  %v425_v3 = vld [vmem:[%s586_s1 + $0x70] sm:$0xff]  ;;  %429 = vmatpush.bf16.msra.mxu3 %v418_v0  ;;  %v427_v5 = vld [vmem:[%s586_s1 + $0x80] sm:$0xff] }
   0x3   :  { %260 = vmatpush.bf16.msra.mxu1 %v426_v1  ;;  %285 = vmatpush.bf16.msra.mxu2 %v428_v4  ;;  %v22_v6 = vld [vmem:[%s587_s0 + $0x10] sm:$0xff]  ;;  %v25_v7 = vld [vmem:[%s587_s0 + $0x28] sm:$0xff]  ;;  %v32_v8 = vld [vmem:[%s588_s2] sm:$0x7] }
   0x4   :  { %v36_v9 = vperm.slane %v32_v8, 2  ;;  %v52_v10 = vld [vmem:[%s589_s3] sm:$0x7]  ;;  %v416_v11 = vld [vmem:[%s586_s1 + $0x28] sm:$0xff]  ;;  %v31_v23 = vld [vmem:[%s587_s0 + $0x58] sm:$0xff]  ;;  %v34_v28 = vperm.slane %v32_v8, 0 }
   0x5   :  { %v424_v12 = vld [vmem:[%s586_s1 + $0x68] sm:$0xff]  ;;  %v56_v13 = vperm.slane %v52_v10, 2  ;;  %v415_v18 = vld [vmem:[%s586_s1 + $0x20] sm:$0xff]  ;;  %v414_v24 = vld [vmem:[%s586_s1 + $0x18] sm:$0xff]  ;;  %v524_v29 = vperm.slane %v32_v8, 1  ;;  %v54_v37 = vperm.slane %v52_v10, 0 }
   0x6   :  { %242 = vmatpush.bf16.msra.mxu0 %v417_v2  ;;  %430 = vmatpush.bf16.msra.mxu3 %v417_v2  ;;  %v42_v14 = vmul.f32 %v36_v9, %v22_v6  ;;  %v45_v15 = vmul.f32 %v36_v9, %v25_v7  ;;  %v423_v19 = vld [vmem:[%s586_s1 + $0x60] sm:$0xff]  ;;  %v422_v25 = vld [vmem:[%s586_s1 + $0x58] sm:$0xff]  ;;  %v21_v31 = vld [vmem:[%s587_s0 + $0x8] sm:$0xff]  ;;  %v51_v36 = vmul.f32 %v36_v9, %v31_v23  ;;  %v55_v38 = vperm.slane %v52_v10, 1 }
   0x7   :  { %261 = vmatpush.bf16.msra.mxu1 %v425_v3  ;;  %286 = vmatpush.bf16.msra.mxu2 %v427_v5  ;;  %v28_v22 = vld [vmem:[%s587_s0 + $0x40] sm:$0xff]  ;;  %v23_v30 = vld [vmem:[%s587_s0 + $0x18] sm:$0xff]  ;;  %v26_v33 = vld [vmem:[%s587_s0 + $0x30] sm:$0xff]  ;;  %v41_v41 = vmul.f32 %v524_v29, %v21_v31 }
   0x8   :  { %v62_v16 = vadd.f32 %v56_v13, %v42_v14  ;;  %v65_v17 = vadd.f32 %v56_v13, %v45_v15  ;;  %v20_v27 = vld [vmem:[%s587_s0] sm:$0xff]  ;;  %v29_v34 = vld [vmem:[%s587_s0 + $0x48] sm:$0xff]  ;;  %v48_v35 = vmul.f32 %v36_v9, %v28_v22  ;;  %v43_v40 = vmul.f32 %v34_v28, %v23_v30  ;;  %v413_v43 = vld [vmem:[%s586_s1 + $0x10] sm:$0xff] }
   0x9   :  { %v24_v32 = vld [vmem:[%s587_s0 + $0x20] sm:$0xff]  ;;  %v40_v39 = vmul.f32 %v34_v28, %v20_v27  ;;  %v421_v44 = vld [vmem:[%s586_s1 + $0x50] sm:$0xff]  ;;  %v46_v45 = vmul.f32 %v34_v28, %v26_v33  ;;  %v49_v46 = vmul.f32 %v34_v28, %v29_v34  ;;  %v71_v48 = vadd.f32 %v56_v13, %v51_v36  ;;  %v412_v53 = vld [vmem:[%s586_s1 + $0x8] sm:$0xff] }
   0xa   :  { %243 = vmatpush.bf16.msra.mxu0 %v416_v11  ;;  %431 = vmatpush.bf16.msra.mxu3 %v416_v11  ;;  %v74_v20 = vmax.f32 %v62_v16, 0.0  ;;  %v77_v21 = vmax.f32 %v65_v17, 0.0  ;;  %v44_v42 = vmul.f32 %v524_v29, %v24_v32  ;;  %v68_v47 = vadd.f32 %v56_v13, %v48_v35  ;;  %v420_v54 = vld [vmem:[%s586_s1 + $0x48] sm:$0xff]  ;;  %v411_v63 = vld [vmem:[%s586_s1] sm:$0xff]  ;;  %v27_v7 = vld [vmem:[%s587_s0 + $0x38] sm:$0xff] }
   0xb   :  { %262 = vmatpush.bf16.msra.mxu1 %v424_v12  ;;  %v60_v49 = vadd.f32 %v54_v37, %v40_v39  ;;  %v63_v50 = vadd.f32 %v54_v37, %v43_v40  ;;  %v61_v51 = vadd.f32 %v55_v38, %v41_v41  ;;  %v66_v55 = vadd.f32 %v54_v37, %v46_v45  ;;  %v419_v0 = vld [vmem:[%s586_s1 + $0x40] sm:$0xff]  ;;  %v30_v8 = vld [vmem:[%s587_s0 + $0x50] sm:$0xff] }
   0xc   :  { %v86_v26 = vpack.c.bf16 %v77_v21, %v74_v20  ;;  %v64_v52 = vadd.f32 %v55_v38, %v44_v42  ;;  %v69_v56 = vadd.f32 %v54_v37, %v49_v46  ;;  %v80_v57 = vmax.f32 %v68_v47, 0.0 }
   0xd   :  { %v83_v58 = vmax.f32 %v71_v48, 0.0  ;;  %v72_v59 = vmax.f32 %v60_v49, 0.0  ;;  %v75_v60 = vmax.f32 %v63_v50, 0.0  ;;  %v73_v61 = vmax.f32 %v61_v51, 0.0 }
   0xe   :  { %244 = vmatpush.bf16.msra.mxu0 %v415_v18  ;;  %432 = vmatpush.bf16.msra.mxu3 %v415_v18  ;;  %v76_v62 = vmax.f32 %v64_v52, 0.0  ;;  %v78_v1 = vmax.f32 %v66_v55, 0.0  ;;  %v81_v2 = vmax.f32 %v69_v56, 0.0  ;;  %v47_v9 = vmul.f32 %v524_v29, %v27_v7 }
   0xf   :  { %263 = vmatpush.bf16.msra.mxu1 %v423_v19  ;;  %409 = vmatmul.msk.bf16.vlgmr.msra.gmra.mxu2 %vm234_vm0, %v86_v26  ;;  %v89_v3 = vpack.c.bf16 %v83_v58, %v80_v57  ;;  %v84_v4 = vpack.c.bf16 %v75_v60, %v72_v59  ;;  %v50_v10 = vmul.f32 %v524_v29, %v30_v8  ;;  %v324_v49 = vlaneseq }
  0x10   :  { %v85_v5 = vpack.c.bf16 %v76_v62, %v73_v61  ;;  %v87_v6 = vpack.c.bf16 %v81_v2, %v78_v1  ;;  %v67_v11 = vadd.f32 %v55_v38, %v47_v9 }
  0x11   :  { %v70_v12 = vadd.f32 %v55_v38, %v50_v10 }
  0x12   :  { %245 = vmatpush.bf16.msra.mxu0 %v414_v24  ;;  %433 = vmatpush.bf16.msra.mxu3 %v414_v24  ;;  %v79_v13 = vmax.f32 %v67_v11, 0.0 }
  0x13   :  { %264 = vmatpush.bf16.msra.mxu1 %v422_v25  ;;  %v82_v14 = vmax.f32 %v70_v12, 0.0 }
  0x15   :  { %v88_v15 = vpack.c.bf16 %v82_v14, %v79_v13 }
  0x16   :  { %246 = vmatpush.bf16.msra.mxu0 %v413_v43  ;;  %434 = vmatpush.bf16.msra.mxu3 %v413_v43 }
  0x17   :  { %265 = vmatpush.bf16.msra.mxu1 %v421_v44 }
  0x1a   :  { %247 = vmatpush.bf16.msra.mxu0 %v412_v53  ;;  %435 = vmatpush.bf16.msra.mxu3 %v412_v53 }
  0x1b   :  { %266 = vmatpush.bf16.msra.mxu1 %v420_v54  ;;  %v325_v54 = vshrl.u32 %v324_v49, 7 }
  0x1d   :  { %vm326_vm1 = vcmp.eq.s32.totalorder %v325_v54, 0 }
  0x1e   :  { %248 = vmatpush.bf16.msra.mxu0 %v411_v63  ;;  %436 = vmatpush.bf16.msra.mxu3 %v411_v63 }
  0x1f   :  { %267 = vmatpush.bf16.msra.mxu1 %v419_v0  ;;  %410 = vmatmul.msk.bf16.gmra.mxu2 %vm234_vm0, %v89_v3 }
  0x21   :  { %249 = vmatmul.bf16.vlgmr.msra.gmra.mxu0 %v84_v4  ;;  %254 = vmatmul.bf16.vlgmr.msra.gmra.mxu3 %v87_v6 }
  0x22   :  { %268 = vmatmul.bf16.vlgmr.msra.gmra.mxu1 %v85_v5 }
  0x32   :  { %273 = vmatmul.bf16.gmra.mxu1 %v88_v15 }
  0x92   :  { %v288_v16 = vpop.f32.mrf.mxu2 }
  0x9a   :  { %v290_v21 = vpop.f32.mrf.mxu2 }
  0x9e   :  { %v250_v17 = vpop.f32.mrf.mxu0 }
  0x9f   :  { %v269_v18 = vpop.f32.mrf.mxu1 }
  0xa0   :  { %v270_v19 = vadd.f32 %v269_v18, %v250_v17 }
  0xa2   :  { %v289_v20 = vadd.f32 %v288_v16, %v270_v19  ;;  %v293_v27 = vpop.f32.mrf.mxu2 }
  0xa4   :  { %298 = vst [vmem:[%s590_s4] sm:$0xff] %v289_v20  ;;  %v255_v26 = vpop.f32.mrf.mxu3  ;;  %v311_v34 = vmul.f32 %v289_v20, %v289_v20 }
  0xa6   :  { %v252_v22 = vpop.f32.mrf.mxu0 }
  0xa7   :  { %v271_v23 = vpop.f32.mrf.mxu1 }
  0xa8   :  { %v272_v24 = vadd.f32 %v271_v23, %v252_v22 }
  0xaa   :  { %v291_v25 = vadd.f32 %v290_v21, %v272_v24  ;;  %v295_v38 = vpop.f32.mrf.mxu2 }
  0xac   :  { %299 = vst [vmem:[%s590_s4 + $0x8] sm:$0xff] %v291_v25  ;;  %v312_v31 = vmul.f32 %v291_v25, %v291_v25  ;;  %v257_v32 = vpop.f32.mrf.mxu3  ;;  %v302_v35 = vadd.f32 %v291_v25, %v289_v20 }
  0xae   :  { %v315_v39 = vadd.f32 %v312_v31, %v311_v34 }
  0xaf   :  { %v274_v28 = vpop.f32.mrf.mxu1 }
  0xb0   :  { %v275_v29 = vadd.f32 %v274_v28, %v255_v26 }
  0xb2   :  { %v294_v30 = vadd.f32 %v293_v27, %v275_v29 }
  0xb4   :  { %300 = vst [vmem:[%s590_s4 + $0x10] sm:$0xff] %v294_v30  ;;  %v313_v36 = vmul.f32 %v294_v30, %v294_v30  ;;  %v303_v40 = vadd.f32 %v302_v35, %v294_v30 }
  0xb6   :  { %v316_v42 = vadd.f32 %v315_v39, %v313_v36 }
  0xb7   :  { %v276_v33 = vpop.f32.mrf.mxu1 }
  0xb8   :  { %v277_v37 = vadd.f32 %v276_v33, %v257_v32 }
  0xba   :  { %v296_v41 = vadd.f32 %v295_v38, %v277_v37 }
  0xbc   :  { %301 = vst [vmem:[%s590_s4 + $0x18] sm:$0xff] %v296_v41  ;;  %v304_v43 = vadd.f32 %v303_v40, %v296_v41  ;;  %v314_v44 = vmul.f32 %v296_v41, %v296_v41 }
  0xbe   :  { %v305_v45 = vrot.slane %v304_v43, 4  ;;  %v317_v46 = vadd.f32 %v316_v42, %v314_v44 }
  0xc0   :  { %v306_v47 = vadd.f32 %v305_v45, %v304_v43  ;;  %v318_v48 = vrot.slane %v317_v46, 4 }
  0xc2   :  { %v307_v50 = vrot.slane %v306_v47, 2  ;;  %v319_v51 = vadd.f32 %v318_v48, %v317_v46 }
  0xc4   :  { %v308_v52 = vadd.f32 %v307_v50, %v306_v47  ;;  %v320_v53 = vrot.slane %v319_v51, 2 }
  0xc6   :  { %v309_v55 = vrot.slane %v308_v52, 1  ;;  %v321_v56 = vadd.f32 %v320_v53, %v319_v51 }
  0xc8   :  { %v322_v57 = vrot.slane %v321_v56, 1  ;;  %v310_v58 = vadd.f32 %v309_v55, %v308_v52 }
  0xca   :  { %v323_v59 = vadd.f32 %v322_v57, %v321_v56 }
  0xcc   :  { %v327_v60 = vsel %vm326_vm1, %v310_v58, %v323_v59 }
  0xcd   :  { %328 = vst [vmem:[%s591_s5] sm:$0x3] %v327_v60 }

// kernel: conditional_decoder_forward.10
= control target key start
LH: loop header
LB: loop body
LE: loop exit
PB: predicated region body
PF: predicated region fallthrough
CT: control target
= control target key end

     0   :  { %s94_s0 = inlined_call_operand.vmem [shape: f32[32,128], index: 0, kind: input, shape index: {}]   ;;  %s95_s1 = inlined_call_operand.vmem [shape: f32[1,128], index: 1, kind: input, shape index: {}]   ;;  %s96_s2 = inlined_call_operand.vmem [shape: f32[1,128], index: 2, kind: input, shape index: {}]   ;;  %s97_s3 = inlined_call_operand.vmem [shape: f32[32,128], index: 3, kind: output, shape index: {}]  }
   0x1   :  { %v14_v0 = vld [vmem:[%s94_s0] sm:$0xff]  ;;  %v15_v3 = vld [vmem:[%s94_s0 + $0x8] sm:$0xff]  ;;  %v16_v6 = vld [vmem:[%s94_s0 + $0x10] sm:$0xff] }
   0x2   :  { %v42_v1 = vld [vmem:[%s95_s1] ss:$0 sm:$0xff]  ;;  %v17_v7 = vld [vmem:[%s94_s0 + $0x18] sm:$0xff] }
   0x3   :  { %v43_v2 = vld [vmem:[%s96_s2] ss:$0 sm:$0xff]  ;;  %v22_v4 = vmul.f32 %v42_v1, %v14_v0  ;;  %v23_v5 = vmul.f32 %v42_v1, %v15_v3  ;;  %v24_v8 = vmul.f32 %v42_v1, %v16_v6  ;;  %v25_v9 = vmul.f32 %v42_v1, %v17_v7 }
   0x5   :  { %v30_v10 = vadd.f32 %v43_v2, %v22_v4  ;;  %v31_v11 = vadd.f32 %v43_v2, %v23_v5  ;;  %v32_v12 = vadd.f32 %v43_v2, %v24_v8  ;;  %v33_v13 = vadd.f32 %v43_v2, %v25_v9 }
   0x7   :  { %34 = vst [vmem:[%s97_s3] sm:$0xff] %v30_v10 }
   0x8   :  { %35 = vst [vmem:[%s97_s3 + $0x8] sm:$0xff] %v31_v11 }
   0x9   :  { %36 = vst [vmem:[%s97_s3 + $0x10] sm:$0xff] %v32_v12 }
   0xa   :  { %37 = vst [vmem:[%s97_s3 + $0x18] sm:$0xff] %v33_v13 }

// kernel: conditional_decoder_forward.11
= control target key start
LH: loop header
LB: loop body
LE: loop exit
PB: predicated region body
PF: predicated region fallthrough
CT: control target
= control target key end

     0   :  { %vm283_vm0 = vcmask 261120   ;;  %s913_s1 = inlined_call_operand.vmem [shape: bf16[288,128], index: 1, kind: input, shape index: {}]   ;;  %s914_s0 = inlined_call_operand.vmem [shape: f32[128,288], index: 0, kind: input, shape index: {}]   ;;  %s915_s2 = inlined_call_operand.vmem [shape: f32[1,128], index: 2, kind: input, shape index: {}]   ;;  %s916_s3 = inlined_call_operand.vmem [shape: f32[128,128], index: 3, kind: output, shape index: {}]  }
   0x1   :  { %v562_v0 = vld [vmem:[%s913_s1 + $0x38] sm:$0xff]  ;;  %v572_v1 = vld [vmem:[%s913_s1 + $0x88] sm:$0xff]  ;;  %v561_v3 = vld [vmem:[%s913_s1 + $0x30] sm:$0xff] }
   0x2   :  { %v619_v2 = vld [vmem:[%s913_s1 + $0x78] sm:$0xff]  ;;  %308 = vmatpush.bf16.msra.mxu0 %v562_v0  ;;  %573 = vmatpush.bf16.msra.mxu3 %v562_v0  ;;  %v17_v4 = vld [vmem:[%s914_s0 + $0x10] sm:$0xff]  ;;  %v20_v5 = vld [vmem:[%s914_s0 + $0x28] sm:$0xff] }
   0x3   :  { %412 = vmatpush.bf16.msra.mxu2 %v572_v1  ;;  %357 = vmatpush.bf16.msra.mxu1 %v619_v2  ;;  %v571_v6 = vld [vmem:[%s913_s1 + $0x80] sm:$0xff]  ;;  %v637_v7 = vld [vmem:[%s913_s1 + $0x70] sm:$0xff]  ;;  %v65_v8 = vmax.f32 %v17_v4, 0.0  ;;  %v68_v9 = vmax.f32 %v20_v5, 0.0  ;;  %v560_v11 = vld [vmem:[%s913_s1 + $0x28] sm:$0xff] }
   0x4   :  { %v646_v12 = vld [vmem:[%s913_s1 + $0x68] sm:$0xff]  ;;  %v559_v13 = vld [vmem:[%s913_s1 + $0x20] sm:$0xff]  ;;  %v558_v15 = vld [vmem:[%s913_s1 + $0x18] sm:$0xff] }
   0x5   :  { %v113_v10 = vpack.c.bf16 %v68_v9, %v65_v8  ;;  %v656_v14 = vld [vmem:[%s913_s1 + $0x60] sm:$0xff]  ;;  %v665_v16 = vld [vmem:[%s913_s1 + $0x58] sm:$0xff]  ;;  %v557_v19 = vld [vmem:[%s913_s1 + $0x10] sm:$0xff] }
   0x6   :  { %309 = vmatpush.bf16.msra.mxu0 %v561_v3  ;;  %574 = vmatpush.bf16.msra.mxu3 %v561_v3  ;;  %v23_v17 = vld [vmem:[%s914_s0 + $0x40] sm:$0xff]  ;;  %v26_v18 = vld [vmem:[%s914_s0 + $0x58] sm:$0xff]  ;;  %v680_v22 = vld [vmem:[%s913_s1 + $0x50] sm:$0xff] }
   0x7   :  { %413 = vmatpush.bf16.msra.mxu2 %v571_v6  ;;  %358 = vmatpush.bf16.msra.mxu1 %v637_v7  ;;  %v71_v20 = vmax.f32 %v23_v17, 0.0  ;;  %v74_v21 = vmax.f32 %v26_v18, 0.0  ;;  %v556_v23 = vld [vmem:[%s913_s1 + $0x8] sm:$0xff]  ;;  %v15_v26 = vld [vmem:[%s914_s0] sm:$0xff]  ;;  %v18_v27 = vld [vmem:[%s914_s0 + $0x18] sm:$0xff] }
   0x8   :  { %v688_v24 = vld [vmem:[%s913_s1 + $0x48] sm:$0xff]  ;;  %v51_v28 = vld [vmem:[%s914_s0 + $0x120] sm:$0xff]  ;;  %v54_v29 = vld [vmem:[%s914_s0 + $0x138] sm:$0xff]  ;;  %v63_v32 = vmax.f32 %v15_v26, 0.0  ;;  %v66_v33 = vmax.f32 %v18_v27, 0.0 }
   0x9   :  { %v116_v25 = vpack.c.bf16 %v74_v21, %v71_v20  ;;  %v16_v30 = vld [vmem:[%s914_s0 + $0x8] sm:$0xff]  ;;  %v19_v31 = vld [vmem:[%s914_s0 + $0x20] sm:$0xff]  ;;  %v99_v35 = vmax.f32 %v51_v28, 0.0  ;;  %v102_v36 = vmax.f32 %v54_v29, 0.0  ;;  %v29_v43 = vld [vmem:[%s914_s0 + $0x70] sm:$0xff] }
   0xa   :  { %547 = vmatmul.msk.bf16.vlgmr.msra.gmra.mxu2 %vm283_vm0, %v113_v10  ;;  %310 = vmatpush.bf16.msra.mxu0 %v560_v11  ;;  %v555_v34 = vld [vmem:[%s913_s1] sm:$0xff]  ;;  %v64_v37 = vmax.f32 %v16_v30, 0.0  ;;  %v67_v38 = vmax.f32 %v19_v31, 0.0  ;;  %v111_v40 = vpack.c.bf16 %v66_v33, %v63_v32  ;;  %v32_v44 = vld [vmem:[%s914_s0 + $0x88] sm:$0xff]  ;;  %v77_v45 = vmax.f32 %v29_v43, 0.0  ;;  %v21_v48 = vld [vmem:[%s914_s0 + $0x30] sm:$0xff] }
   0xb   :  { %575 = vmatpush.bf16.msra.mxu3 %v560_v11  ;;  %359 = vmatpush.bf16.msra.mxu1 %v646_v12  ;;  %v563_v39 = vld [vmem:[%s913_s1 + $0x40] sm:$0xff]  ;;  %v129_v41 = vpack.c.bf16 %v102_v36, %v99_v35  ;;  %v80_v46 = vmax.f32 %v32_v44, 0.0  ;;  %v24_v49 = vld [vmem:[%s914_s0 + $0x48] sm:$0xff]  ;;  %v57_v50 = vld [vmem:[%s914_s0 + $0x150] sm:$0xff]  ;;  %v69_v54 = vmax.f32 %v21_v48, 0.0 }
   0xc   :  { %v112_v42 = vpack.c.bf16 %v67_v38, %v64_v37  ;;  %v60_v51 = vld [vmem:[%s914_s0 + $0x168] sm:$0xff]  ;;  %v22_v52 = vld [vmem:[%s914_s0 + $0x38] sm:$0xff]  ;;  %v25_v53 = vld [vmem:[%s914_s0 + $0x50] sm:$0xff]  ;;  %v72_v55 = vmax.f32 %v24_v49, 0.0  ;;  %v105_v56 = vmax.f32 %v57_v50, 0.0 }
   0xd   :  { %v119_v47 = vpack.c.bf16 %v80_v46, %v77_v45  ;;  %v108_v57 = vmax.f32 %v60_v51, 0.0  ;;  %v70_v58 = vmax.f32 %v22_v52, 0.0  ;;  %v73_v59 = vmax.f32 %v25_v53, 0.0  ;;  %v35_v63 = vld [vmem:[%s914_s0 + $0xa0] sm:$0xff]  ;;  %v38_v0 = vld [vmem:[%s914_s0 + $0xb8] sm:$0xff]  ;;  %v52_v6 = vld [vmem:[%s914_s0 + $0x128] sm:$0xff] }
   0xe   :  { %311 = vmatpush.bf16.msra.mxu0 %v559_v13  ;;  %v114_v60 = vpack.c.bf16 %v72_v55, %v69_v54  ;;  %v83_v1 = vmax.f32 %v35_v63, 0.0  ;;  %v27_v4 = vld [vmem:[%s914_s0 + $0x60] sm:$0xff]  ;;  %v30_v5 = vld [vmem:[%s914_s0 + $0x78] sm:$0xff]  ;;  %v28_v8 = vld [vmem:[%s914_s0 + $0x68] sm:$0xff] }
   0xf   :  { %576 = vmatpush.bf16.msra.mxu3 %v559_v13  ;;  %360 = vmatpush.bf16.msra.mxu1 %v656_v14  ;;  %v132_v61 = vpack.c.bf16 %v108_v57, %v105_v56  ;;  %v115_v62 = vpack.c.bf16 %v73_v59, %v70_v58  ;;  %v31_v9 = vld [vmem:[%s914_s0 + $0x80] sm:$0xff]  ;;  %v75_v10 = vmax.f32 %v27_v4, 0.0  ;;  %v78_v11 = vmax.f32 %v30_v5, 0.0  ;;  %v44_v20 = vld [vmem:[%s914_s0 + $0xe8] sm:$0xff]  ;;  %v58_v26 = vld [vmem:[%s914_s0 + $0x158] sm:$0xff] }
  0x10   :  { %v61_v27 = vld [vmem:[%s914_s0 + $0x170] sm:$0xff]  ;;  %v34_v28 = vld [vmem:[%s914_s0 + $0x98] sm:$0xff]  ;;  %v106_v32 = vmax.f32 %v58_v26, 0.0  ;;  %v39_v44 = vld [vmem:[%s914_s0 + $0xc0] sm:$0xff] }
  0x11   :  { %v37_v29 = vld [vmem:[%s914_s0 + $0xb0] sm:$0xff]  ;;  %v109_v33 = vmax.f32 %v61_v27, 0.0  ;;  %v42_v45 = vld [vmem:[%s914_s0 + $0xd8] sm:$0xff]  ;;  %v40_v46 = vld [vmem:[%s914_s0 + $0xc8] sm:$0xff]  ;;  %v87_v48 = vmax.f32 %v39_v44, 0.0 }
  0x12   :  { %312 = vmatpush.bf16.msra.mxu0 %v558_v15  ;;  %v85_v35 = vmax.f32 %v37_v29, 0.0  ;;  %v90_v49 = vmax.f32 %v42_v45, 0.0  ;;  %v88_v50 = vmax.f32 %v40_v46, 0.0  ;;  %v53_v54 = vld [vmem:[%s914_s0 + $0x130] sm:$0xff]  ;;  %v56_v55 = vld [vmem:[%s914_s0 + $0x148] sm:$0xff]  ;;  %v59_v5 = vld [vmem:[%s914_s0 + $0x160] sm:$0xff] }
  0x13   :  { %577 = vmatpush.bf16.msra.mxu3 %v558_v15  ;;  %361 = vmatpush.bf16.msra.mxu1 %v665_v16  ;;  %v79_v15 = vmax.f32 %v31_v9, 0.0  ;;  %v133_v37 = vpack.c.bf16 %v109_v33, %v106_v32  ;;  %v101_v56 = vmax.f32 %v53_v54, 0.0  ;;  %v104_v57 = vmax.f32 %v56_v55, 0.0  ;;  %v45_v59 = vld [vmem:[%s914_s0 + $0xf0] sm:$0xff] }
  0x14   :  { %v123_v52 = vpack.c.bf16 %v90_v49, %v87_v48  ;;  %v93_v63 = vmax.f32 %v45_v59, 0.0 }
  0x15   :  { %v131_v58 = vpack.c.bf16 %v104_v57, %v101_v56 }
  0x16   :  { %313 = vmatpush.bf16.msra.mxu0 %v557_v19 }
  0x17   :  { %578 = vmatpush.bf16.msra.mxu3 %v557_v19  ;;  %362 = vmatpush.bf16.msra.mxu1 %v680_v22  ;;  %v41_v19 = vld [vmem:[%s914_s0 + $0xd0] sm:$0xff] }
  0x18   :  { %v89_v21 = vmax.f32 %v41_v19, 0.0 }
  0x1a   :  { %548 = vmatmul.msk.bf16.gmra.mxu2 %vm283_vm0, %v116_v25  ;;  %314 = vmatpush.bf16.msra.mxu0 %v556_v23  ;;  %v36_v25 = vld [vmem:[%s914_s0 + $0xa8] sm:$0xff] }
  0x1b   :  { %579 = vmatpush.bf16.msra.mxu3 %v556_v23  ;;  %363 = vmatpush.bf16.msra.mxu1 %v688_v24  ;;  %v84_v31 = vmax.f32 %v36_v25, 0.0 }
  0x1e   :  { %315 = vmatpush.bf16.msra.mxu0 %v555_v34 }
  0x1f   :  { %580 = vmatpush.bf16.msra.mxu3 %v555_v34  ;;  %364 = vmatpush.bf16.msra.mxu1 %v563_v39  ;;  %v82_v34 = vmax.f32 %v34_v28, 0.0 }
  0x21   :  { %316 = vmatmul.bf16.vlgmr.msra.gmra.mxu0 %v111_v40  ;;  %v121_v38 = vpack.c.bf16 %v85_v35, %v82_v34  ;;  %v50_v40 = vld [vmem:[%s914_s0 + $0x118] sm:$0xff] }
  0x22   :  { %346 = vmatmul.bf16.vlgmr.msra.gmra.mxu3 %v129_v41  ;;  %365 = vmatmul.bf16.vlgmr.msra.gmra.mxu1 %v112_v42  ;;  %v98_v42 = vmax.f32 %v50_v40, 0.0 }
  0x23   :  { %581 = vmatpush.bf16.msrb.mxu3 %v619_v2  ;;  %v86_v2 = vmax.f32 %v38_v0, 0.0 }
  0x25   :  { %v122_v3 = vpack.c.bf16 %v86_v2, %v83_v1 }
  0x27   :  { %582 = vmatpush.bf16.msrb.mxu3 %v637_v7  ;;  %v55_v7 = vld [vmem:[%s914_s0 + $0x140] sm:$0xff] }
  0x28   :  { %v103_v13 = vmax.f32 %v55_v7, 0.0  ;;  %v107_v7 = vmax.f32 %v59_v5, 0.0 }
  0x2a   :  { %549 = vmatmul.msk.bf16.gmra.mxu2 %vm283_vm0, %v119_v47  ;;  %v43_v47 = vld [vmem:[%s914_s0 + $0xe0] sm:$0xff] }
  0x2b   :  { %583 = vmatpush.bf16.msrb.mxu3 %v646_v12  ;;  %v100_v12 = vmax.f32 %v52_v6, 0.0  ;;  %v91_v51 = vmax.f32 %v43_v47, 0.0  ;;  %v62_v6 = vld [vmem:[%s914_s0 + $0x178] sm:$0xff] }
  0x2d   :  { %v130_v17 = vpack.c.bf16 %v103_v13, %v100_v12  ;;  %v124_v53 = vpack.c.bf16 %v91_v51, %v88_v50  ;;  %v847_v12 = vld [vmem:[%s915_s2] ss:$0 sm:$0xff] }
  0x2f   :  { %584 = vmatpush.bf16.msrb.mxu3 %v656_v14  ;;  %v76_v14 = vmax.f32 %v28_v8, 0.0  ;;  %v110_v8 = vmax.f32 %v62_v6, 0.0 }
  0x31   :  { %321 = vmatmul.bf16.gmra.mxu0 %v114_v60  ;;  %v118_v18 = vpack.c.bf16 %v79_v15, %v76_v14  ;;  %v48_v60 = vld [vmem:[%s914_s0 + $0x108] sm:$0xff]  ;;  %v134_v9 = vpack.c.bf16 %v110_v8, %v107_v7 }
  0x32   :  { %351 = vmatmul.bf16.gmra.mxu3 %v132_v61  ;;  %370 = vmatmul.bf16.gmra.mxu1 %v115_v62  ;;  %v46_v61 = vld [vmem:[%s914_s0 + $0xf8] sm:$0xff]  ;;  %v49_v62 = vld [vmem:[%s914_s0 + $0x110] sm:$0xff]  ;;  %v96_v0 = vmax.f32 %v48_v60, 0.0 }
  0x33   :  { %585 = vmatpush.bf16.msrb.mxu3 %v665_v16  ;;  %v117_v16 = vpack.c.bf16 %v78_v11, %v75_v10  ;;  %v94_v1 = vmax.f32 %v46_v61, 0.0  ;;  %v97_v2 = vmax.f32 %v49_v62, 0.0 }
  0x35   :  { %v127_v4 = vpack.c.bf16 %v97_v2, %v94_v1 }
  0x37   :  { %586 = vmatpush.bf16.msrb.mxu3 %v680_v22  ;;  %v92_v22 = vmax.f32 %v44_v20, 0.0 }
  0x39   :  { %v125_v23 = vpack.c.bf16 %v92_v22, %v89_v21 }
  0x3a   :  { %550 = vmatmul.msk.bf16.gmra.mxu2 %vm283_vm0, %v122_v3  ;;  %v126_v3 = vpack.c.bf16 %v96_v0, %v93_v63 }
  0x3b   :  { %587 = vmatpush.bf16.msrb.mxu3 %v688_v24  ;;  %v33_v24 = vld [vmem:[%s914_s0 + $0x90] sm:$0xff] }
  0x3c   :  { %v81_v30 = vmax.f32 %v33_v24, 0.0 }
  0x3e   :  { %v120_v36 = vpack.c.bf16 %v84_v31, %v81_v30 }
  0x3f   :  { %588 = vmatpush.bf16.msrb.mxu3 %v563_v39  ;;  %v47_v39 = vld [vmem:[%s914_s0 + $0x100] sm:$0xff] }
  0x40   :  { %v95_v41 = vmax.f32 %v47_v39, 0.0 }
  0x41   :  { %326 = vmatmul.bf16.gmra.mxu0 %v117_v16 }
  0x42   :  { %395 = vmatmul.bf16.vlgmr.msrb.gmra.mxu3 %v130_v17  ;;  %375 = vmatmul.bf16.gmra.mxu1 %v118_v18  ;;  %v128_v43 = vpack.c.bf16 %v98_v42, %v95_v41 }
  0x4a   :  { %551 = vmatmul.msk.bf16.gmra.mxu2 %vm283_vm0, %v125_v23 }
  0x51   :  { %331 = vmatmul.bf16.gmra.mxu0 %v120_v36 }
  0x52   :  { %400 = vmatmul.bf16.gmra.mxu3 %v133_v37  ;;  %380 = vmatmul.bf16.gmra.mxu1 %v121_v38 }
  0x5a   :  { %552 = vmatmul.msk.bf16.gmra.mxu2 %vm283_vm0, %v128_v43 }
  0x61   :  { %336 = vmatmul.bf16.gmra.mxu0 %v123_v52 }
  0x62   :  { %385 = vmatmul.bf16.gmra.mxu1 %v124_v53 }
  0x6a   :  { %553 = vmatmul.msk.bf16.gmra.mxu2 %vm283_vm0, %v131_v58 }
  0x71   :  { %341 = vmatmul.bf16.gmra.mxu0 %v126_v3 }
  0x72   :  { %390 = vmatmul.bf16.gmra.mxu1 %v127_v4 }
  0x7a   :  { %554 = vmatmul.msk.bf16.gmra.mxu2 %vm283_vm0, %v134_v9 }
  0x8d   :  { %v415_v10 = vpop.f32.mrf.mxu2 }
  0x95   :  { %v417_v11 = vpop.f32.mrf.mxu2 }
  0x9d   :  { %v420_v13 = vpop.f32.mrf.mxu2 }
  0x9e   :  { %v317_v14 = vpop.f32.mrf.mxu0 }
  0x9f   :  { %v318_v15 = vadd.f32 %v847_v12, %v317_v14  ;;  %v366_v16 = vpop.f32.mrf.mxu1 }
  0xa1   :  { %v367_v17 = vadd.f32 %v366_v16, %v318_v15 }
  0xa3   :  { %v416_v18 = vadd.f32 %v415_v10, %v367_v17 }
  0xa5   :  { %455 = vst [vmem:[%s916_s3] sm:$0xff] %v416_v18  ;;  %v422_v19 = vpop.f32.mrf.mxu2  ;;  %v347_v36 = vpop.f32.mrf.mxu3 }
  0xa6   :  { %v319_v20 = vpop.f32.mrf.mxu0 }
  0xa7   :  { %v320_v21 = vadd.f32 %v847_v12, %v319_v20  ;;  %v368_v22 = vpop.f32.mrf.mxu1 }
  0xa9   :  { %v369_v23 = vadd.f32 %v368_v22, %v320_v21 }
  0xab   :  { %v418_v24 = vadd.f32 %v417_v11, %v369_v23 }
  0xad   :  { %456 = vst [vmem:[%s916_s3 + $0x8] sm:$0xff] %v418_v24  ;;  %v425_v25 = vpop.f32.mrf.mxu2  ;;  %v349_v44 = vpop.f32.mrf.mxu3 }
  0xae   :  { %v322_v26 = vpop.f32.mrf.mxu0  ;;  %v350_v23 = vadd.f32 %v847_v12, %v349_v44 }
  0xaf   :  { %v323_v27 = vadd.f32 %v847_v12, %v322_v26  ;;  %v371_v28 = vpop.f32.mrf.mxu1 }
  0xb1   :  { %v372_v29 = vadd.f32 %v371_v28, %v323_v27 }
  0xb3   :  { %v421_v30 = vadd.f32 %v420_v13, %v372_v29  ;;  %v348_v13 = vadd.f32 %v847_v12, %v347_v36 }
  0xb5   :  { %457 = vst [vmem:[%s916_s3 + $0x10] sm:$0xff] %v421_v30  ;;  %v427_v31 = vpop.f32.mrf.mxu2  ;;  %v352_v53 = vpop.f32.mrf.mxu3 }
  0xb6   :  { %v324_v32 = vpop.f32.mrf.mxu0 }
  0xb7   :  { %v325_v33 = vadd.f32 %v847_v12, %v324_v32  ;;  %v373_v34 = vpop.f32.mrf.mxu1 }
  0xb9   :  { %v374_v35 = vadd.f32 %v373_v34, %v325_v33  ;;  %v353_v33 = vadd.f32 %v847_v12, %v352_v53 }
  0xbb   :  { %v423_v37 = vadd.f32 %v422_v19, %v374_v35 }
  0xbd   :  { %458 = vst [vmem:[%s916_s3 + $0x18] sm:$0xff] %v423_v37  ;;  %v430_v38 = vpop.f32.mrf.mxu2  ;;  %v354_v62 = vpop.f32.mrf.mxu3 }
  0xbe   :  { %v327_v39 = vpop.f32.mrf.mxu0 }
  0xbf   :  { %v328_v40 = vadd.f32 %v847_v12, %v327_v39  ;;  %v376_v41 = vpop.f32.mrf.mxu1  ;;  %v355_v39 = vadd.f32 %v847_v12, %v354_v62 }
  0xc1   :  { %v377_v42 = vadd.f32 %v376_v41, %v328_v40 }
  0xc3   :  { %v426_v43 = vadd.f32 %v425_v25, %v377_v42 }
  0xc5   :  { %459 = vst [vmem:[%s916_s3 + $0x20] sm:$0xff] %v426_v43  ;;  %v432_v45 = vpop.f32.mrf.mxu2  ;;  %v396_v6 = vpop.f32.mrf.mxu3 }
  0xc6   :  { %v329_v46 = vpop.f32.mrf.mxu0  ;;  %v397_v16 = vadd.f32 %v396_v6, %v348_v13 }
  0xc7   :  { %v330_v47 = vadd.f32 %v847_v12, %v329_v46  ;;  %v378_v48 = vpop.f32.mrf.mxu1 }
  0xc9   :  { %v379_v49 = vadd.f32 %v378_v48, %v330_v47 }
  0xcb   :  { %v428_v50 = vadd.f32 %v427_v31, %v379_v49 }
  0xcd   :  { %460 = vst [vmem:[%s916_s3 + $0x28] sm:$0xff] %v428_v50  ;;  %v435_v51 = vpop.f32.mrf.mxu2  ;;  %v398_v17 = vpop.f32.mrf.mxu3 }
  0xce   :  { %v332_v52 = vpop.f32.mrf.mxu0  ;;  %v399_v26 = vadd.f32 %v398_v17, %v350_v23 }
  0xcf   :  { %v333_v54 = vadd.f32 %v847_v12, %v332_v52  ;;  %v381_v55 = vpop.f32.mrf.mxu1 }
  0xd1   :  { %v382_v56 = vadd.f32 %v381_v55, %v333_v54 }
  0xd3   :  { %v431_v57 = vadd.f32 %v430_v38, %v382_v56 }
  0xd5   :  { %461 = vst [vmem:[%s916_s3 + $0x30] sm:$0xff] %v431_v57  ;;  %v437_v58 = vpop.f32.mrf.mxu2  ;;  %v401_v30 = vpop.f32.mrf.mxu3 }
  0xd6   :  { %v334_v59 = vpop.f32.mrf.mxu0  ;;  %v402_v36 = vadd.f32 %v401_v30, %v353_v33 }
  0xd7   :  { %v335_v60 = vadd.f32 %v847_v12, %v334_v59  ;;  %v383_v61 = vpop.f32.mrf.mxu1 }
  0xd9   :  { %v384_v63 = vadd.f32 %v383_v61, %v335_v60 }
  0xdb   :  { %v433_v0 = vadd.f32 %v432_v45, %v384_v63 }
  0xdd   :  { %462 = vst [vmem:[%s916_s3 + $0x38] sm:$0xff] %v433_v0  ;;  %v440_v1 = vpop.f32.mrf.mxu2  ;;  %v403_v40 = vpop.f32.mrf.mxu3 }
  0xde   :  { %v337_v2 = vpop.f32.mrf.mxu0  ;;  %v404_v41 = vadd.f32 %v403_v40, %v355_v39 }
  0xdf   :  { %v338_v3 = vadd.f32 %v847_v12, %v337_v2  ;;  %v386_v4 = vpop.f32.mrf.mxu1 }
  0xe1   :  { %v387_v5 = vadd.f32 %v386_v4, %v338_v3 }
  0xe3   :  { %v436_v7 = vadd.f32 %v435_v51, %v387_v5 }
  0xe5   :  { %463 = vst [vmem:[%s916_s3 + $0x40] sm:$0xff] %v436_v7  ;;  %v442_v8 = vpop.f32.mrf.mxu2 }
  0xe6   :  { %v339_v9 = vpop.f32.mrf.mxu0 }
  0xe7   :  { %v340_v10 = vadd.f32 %v847_v12, %v339_v9  ;;  %v388_v11 = vpop.f32.mrf.mxu1 }
  0xe9   :  { %v389_v14 = vadd.f32 %v388_v11, %v340_v10 }
  0xeb   :  { %v438_v15 = vadd.f32 %v437_v58, %v389_v14 }
  0xed   :  { %464 = vst [vmem:[%s916_s3 + $0x48] sm:$0xff] %v438_v15  ;;  %v445_v18 = vpop.f32.mrf.mxu2 }
  0xee   :  { %v446_v19 = vadd.f32 %v445_v18, %v397_v16  ;;  %v342_v20 = vpop.f32.mrf.mxu0 }
  0xef   :  { %v343_v21 = vadd.f32 %v847_v12, %v342_v20  ;;  %v391_v22 = vpop.f32.mrf.mxu1 }
  0xf0   :  { %467 = vst [vmem:[%s916_s3 + $0x60] sm:$0xff] %v446_v19 }
  0xf1   :  { %v392_v24 = vadd.f32 %v391_v22, %v343_v21 }
  0xf3   :  { %v441_v25 = vadd.f32 %v440_v1, %v392_v24 }
  0xf5   :  { %465 = vst [vmem:[%s916_s3 + $0x50] sm:$0xff] %v441_v25  ;;  %v447_v27 = vpop.f32.mrf.mxu2 }
  0xf6   :  { %v448_v28 = vadd.f32 %v447_v27, %v399_v26  ;;  %v344_v29 = vpop.f32.mrf.mxu0 }
  0xf7   :  { %v345_v31 = vadd.f32 %v847_v12, %v344_v29  ;;  %v393_v32 = vpop.f32.mrf.mxu1 }
  0xf8   :  { %468 = vst [vmem:[%s916_s3 + $0x68] sm:$0xff] %v448_v28 }
  0xf9   :  { %v394_v34 = vadd.f32 %v393_v32, %v345_v31 }
  0xfb   :  { %v443_v35 = vadd.f32 %v442_v8, %v394_v34 }
  0xfd   :  { %466 = vst [vmem:[%s916_s3 + $0x58] sm:$0xff] %v443_v35  ;;  %v450_v37 = vpop.f32.mrf.mxu2 }
  0xfe   :  { %v451_v38 = vadd.f32 %v450_v37, %v402_v36 }
 0x100   :  { %469 = vst [vmem:[%s916_s3 + $0x70] sm:$0xff] %v451_v38 }
 0x105   :  { %v452_v42 = vpop.f32.mrf.mxu2 }
 0x106   :  { %v453_v43 = vadd.f32 %v452_v42, %v404_v41 }
 0x108   :  { %470 = vst [vmem:[%s916_s3 + $0x78] sm:$0xff] %v453_v43 }

</bundles_post_ra>
